<compile_context>
chip_gen: v7x
topology: tpu7x:2x2x1
jax: 0.10.0
libtpu: 0.0.40
codegen_flags: <defaults>
</compile_context>

<pallas_src>
import jax
import jax.numpy as jnp
import numpy as np
from jax import lax
from jax.experimental import pallas as pl
from jax.experimental.pallas import tpu as pltpu

_WPAD = 8  # sublane-aligned left zero margin for in-VMEM padded activations


def _out_hw(h):  # conv with k=3, s=2, p=1
    return (h - 1) // 2 + 1


# ----------------------------------------------------------------------------
# Fused encoder kernel
# ----------------------------------------------------------------------------
def _build_fused_encoder(B, H, W, Cin, N, M, out_dtype=jnp.float32):
    H1, W1 = _out_hw(H), _out_hw(W)
    H2, W2 = _out_hw(H1), _out_hw(W1)
    H3, W3 = _out_hw(H2), _out_hw(W2)
    H4, W4 = _out_hw(H3), _out_hw(W3)

    def stash_padded(dst_ref, y, h, w):
        # Write y (h, w, c) into a zeroed scratch that represents the
        # zero-padded activation.  Row offset 1, col offset _WPAD (aligned).
        dst_ref[...] = jnp.zeros_like(dst_ref)
        dst_ref[1:h + 1, _WPAD:_WPAD + w, :] = y

    def conv_s2(src_ref, hout, wout, cin, w_ref, b_ref):
        # im2col (K = 9*cin) + ONE MXU matmul.  Tap (kh, kw) of the padded
        # activation starts at row kh / col (_WPAD - 1 + kw), stride 2.
        taps = []
        for kh in range(3):
            for kw in range(3):
                p = src_ref[pl.ds(kh, hout, 2), pl.ds(_WPAD - 1 + kw, wout, 2), :]
                taps.append(p.reshape(hout * wout, cin))
        col = jnp.concatenate(taps, axis=-1).astype(jnp.bfloat16)  # one cast/layer
        y = jnp.dot(col, w_ref[...], preferred_element_type=jnp.float32)
        return y + b_ref[...]  # (hout*wout, cout) f32

    def kernel(xcol_ref, w1_ref, b1_ref, w2_ref, b2_ref, g_ref, beta_ref,
               w3_ref, b3_ref, w4_ref, b4_ref, o_ref,
               y1p_ref, y2p_ref, y3p_ref):
        # ---- conv1: im2col was done wrapper-side (K = 9*Cin) ----
        y1 = jnp.dot(xcol_ref[...], w1_ref[...],
                     preferred_element_type=jnp.float32) + b1_ref[...]
        stash_padded(y1p_ref, y1.reshape(H1, W1, N), H1, W1)

        # ---- conv2 ----
        y2 = conv_s2(y1p_ref, H2, W2, N, w2_ref, b2_ref)  # (H2*W2, N) f32

        # ---- SimplifiedGDN: y_i = x_i / (beta_i + sum_j gamma_ij |x_j|) ----
        denom = jnp.dot(jnp.abs(y2).astype(jnp.bfloat16), g_ref[...],
                        preferred_element_type=jnp.float32) + beta_ref[...]
        y2 = y2 * pl.reciprocal(denom, approx=False)
        stash_padded(y2p_ref, y2.reshape(H2, W2, N), H2, W2)

        # ---- conv3 ----
        y3 = conv_s2(y2p_ref, H3, W3, N, w3_ref, b3_ref)
        stash_padded(y3p_ref, y3.reshape(H3, W3, M), H3, W3)

        # ---- conv4 ----
        y4 = conv_s2(y3p_ref, H4, W4, M, w4_ref, b4_ref)
        o_ref[...] = y4.reshape(H4, W4, M).astype(o_ref.dtype)

    grid_spec = pltpu.PrefetchScalarGridSpec(
        num_scalar_prefetch=0,
        grid=(B,),
        in_specs=[
            pl.BlockSpec((None, H1 * W1, 9 * Cin), lambda b: (b, 0, 0)),  # xcol bf16
            pl.BlockSpec((9 * Cin, N), lambda b: (0, 0)),                 # w1 bf16
            pl.BlockSpec((1, N), lambda b: (0, 0)),                       # b1 f32
            pl.BlockSpec((9 * N, N), lambda b: (0, 0)),                   # w2 bf16
            pl.BlockSpec((1, N), lambda b: (0, 0)),                       # b2 f32
            pl.BlockSpec((N, N), lambda b: (0, 0)),                       # gamma^T bf16
            pl.BlockSpec((1, N), lambda b: (0, 0)),                       # beta f32
            pl.BlockSpec((9 * N, M), lambda b: (0, 0)),                   # w3 bf16
            pl.BlockSpec((1, M), lambda b: (0, 0)),                       # b3 f32
            pl.BlockSpec((9 * M, M), lambda b: (0, 0)),                   # w4 bf16
            pl.BlockSpec((1, M), lambda b: (0, 0)),                       # b4 f32
        ],
        out_specs=pl.BlockSpec((None, H4, W4, M), lambda b: (b, 0, 0, 0)),
        scratch_shapes=[
            pltpu.VMEM((H1 + 2, _WPAD + max(W1, 2 * W2), N), jnp.float32),
            pltpu.VMEM((H2 + 2, _WPAD + max(W2, 2 * W3), N), jnp.float32),
            pltpu.VMEM((H3 + 2, _WPAD + max(W3, 2 * W4), M), jnp.float32),
        ],
    )

    return pl.pallas_call(
        kernel,
        out_shape=jax.ShapeDtypeStruct((B, H4, W4, M), out_dtype),
        grid_spec=grid_spec,
        compiler_params=pltpu.CompilerParams(
            dimension_semantics=("parallel",)),
    )


# ----------------------------------------------------------------------------
# Parameters (deterministic synthetic init; shapes match the PyTorch __init__)
# ----------------------------------------------------------------------------
def init_params(key, in_channels, filter_channels, out_channels, kernel_size=3):
    N, M = filter_channels, out_channels
    ks = jax.random.split(key, 9)

    def conv_init(kw_key, kb_key, cin, cout):
        fan_in = cin * kernel_size * kernel_size
        w = jax.random.normal(kw_key, (kernel_size, kernel_size, cin, cout),
                              jnp.float32) / np.sqrt(fan_in)
        b = 0.01 * jax.random.normal(kb_key, (cout,), jnp.float32)
        return w, b

    w1, b1 = conv_init(ks[0], ks[1], in_channels, N)
    w2, b2 = conv_init(ks[2], ks[3], N, N)
    w3, b3 = conv_init(ks[4], ks[5], N, M)
    w4, b4 = conv_init(ks[6], ks[7], M, M)

    # SimplifiedGDN init: beta = ones(N), gamma = 0.1 * eye(N); the forward-pass
    # clamps (beta >= 1e-6, gamma >= 0) are enforced here at init time.
    gdn_gamma = 0.1 * jnp.eye(N, dtype=jnp.float32) \
        + 0.01 * jnp.abs(jax.random.normal(ks[8], (N, N), jnp.float32))
    gdn_gamma = jnp.maximum(gdn_gamma, 0.0)
    gdn_beta = jnp.maximum(jnp.ones((N,), jnp.float32), 1e-6)

    return dict(w1=w1, b1=b1, w2=w2, b2=b2, w3=w3, b3=b3, w4=w4, b4=b4,
                gdn_gamma=gdn_gamma, gdn_beta=gdn_beta)


# ----------------------------------------------------------------------------
# Forward pass (mirrors DVCResidualEncoder.forward)
# ----------------------------------------------------------------------------
def dvc_residual_encoder(image_nchw, params):
    B, Cin, H, W = image_nchw.shape
    N = params["w1"].shape[-1]
    M = params["w3"].shape[-1]
    H1, W1 = _out_hw(H), _out_hw(W)
    H2, W2 = _out_hw(H1), _out_hw(W1)
    H3, W3 = _out_hw(H2), _out_hw(W2)

    # sizes recorded before each Conv2d, exactly like the PyTorch module
    sizes = [(B, Cin, H, W), (B, N, H1, W1), (B, N, H2, W2), (B, M, H3, W3)]

    x = jnp.transpose(image_nchw, (0, 2, 3, 1)).astype(jnp.float32)  # NCHW->NHWC

    # ---- layer-1 im2col at the wrapper (XLA layout glue): last dim = 9*Cin ----
    xp = jnp.pad(x, ((0, 0), (1, 1), (1, 1), (0, 0)))
    taps = [
        lax.slice(xp, (0, kh, kw, 0),
                  (B, kh + 2 * (H1 - 1) + 1, kw + 2 * (W1 - 1) + 1, Cin),
                  (1, 2, 2, 1))
        for kh in range(3) for kw in range(3)
    ]
    xcol = jnp.concatenate(taps, axis=-1).reshape(B, H1 * W1, 9 * Cin)
    xcol = xcol.astype(jnp.bfloat16)

    bf16 = lambda a: a.astype(jnp.bfloat16)
    f32row = lambda v: v.reshape(1, -1).astype(jnp.float32)

    call = _build_fused_encoder(B, H, W, Cin, N, M, out_dtype=jnp.float32)
    y = call(
        xcol,
        bf16(params["w1"].reshape(9 * Cin, N)), f32row(params["b1"]),
        bf16(params["w2"].reshape(9 * N, N)),   f32row(params["b2"]),
        bf16(params["gdn_gamma"].T),            f32row(params["gdn_beta"]),
        bf16(params["w3"].reshape(9 * N, M)),   f32row(params["b3"]),
        bf16(params["w4"].reshape(9 * M, M)),   f32row(params["b4"]),
    )
    return jnp.transpose(y, (0, 3, 1, 2)), sizes  # back to NCHW


# ----------------------------------------------------------------------------
# Pure-JAX reference (same bf16-operand / f32-accumulation matmul policy)
# ----------------------------------------------------------------------------
def _ref_conv_s2(x, w, b):
    y = lax.conv_general_dilated(
        x.astype(jnp.bfloat16), w.astype(jnp.bfloat16),
        window_strides=(2, 2), padding=((1, 1), (1, 1)),
        dimension_numbers=("NHWC", "HWIO", "NHWC"),
        preferred_element_type=jnp.float32)
    return y + b[None, None, None, :]


def _ref_encoder(image_nchw, params):
    x = jnp.transpose(image_nchw, (0, 2, 3, 1)).astype(jnp.float32)
    x = _ref_conv_s2(x, params["w1"], params["b1"])
    x = _ref_conv_s2(x, params["w2"], params["b2"])
    denom = jnp.einsum("bhwc,oc->bhwo",
                       jnp.abs(x).astype(jnp.bfloat16),
                       params["gdn_gamma"].astype(jnp.bfloat16),
                       preferred_element_type=jnp.float32) + params["gdn_beta"]
    x = x / denom
    x = _ref_conv_s2(x, params["w3"], params["b3"])
    x = _ref_conv_s2(x, params["w4"], params["b4"])
    return jnp.transpose(x, (0, 3, 1, 2))


# ----------------------------------------------------------------------------
if __name__ == "__main__":
    key = jax.random.PRNGKey(0)
    k_img, k_par = jax.random.split(key)

    B, C_IN, H, W = 2, 3, 32, 32          # small test shapes
    N_FILT, M_OUT = 16, 32                # filter_channels, out_channels

    image = jax.random.normal(k_img, (B, C_IN, H, W), jnp.float32)
    params = init_params(k_par, C_IN, N_FILT, M_OUT)

    out, sizes = dvc_residual_encoder(image, params)
    out = jax.block_until_ready(out)

    # sanity: shapes + numerics vs pure-JAX reference (same bf16 matmul policy)
    expected_sizes = [(B, C_IN, 32, 32), (B, N_FILT, 16, 16),
                      (B, N_FILT, 8, 8), (B, M_OUT, 4, 4)]
    assert list(sizes) == expected_sizes, (sizes, expected_sizes)
    assert out.shape == (B, M_OUT, 2, 2), out.shape

    ref = jax.block_until_ready(_ref_encoder(image, params))
    np.testing.assert_allclose(np.asarray(out), np.asarray(ref),
                               rtol=1e-2, atol=2e-3)

    print("KERNEL_OK")
</pallas_src>

<mosaic_0001>
module attributes {stable_mosaic.version = 11 : i64} {
  func.func @kernel(%arg0: i32, %arg1: memref<1x256x27xbf16, #tpu.memory_space<vmem>>, %arg2: memref<27x16xbf16, #tpu.memory_space<vmem>>, %arg3: memref<1x16xf32, #tpu.memory_space<vmem>>, %arg4: memref<144x16xbf16, #tpu.memory_space<vmem>>, %arg5: memref<1x16xf32, #tpu.memory_space<vmem>>, %arg6: memref<16x16xbf16, #tpu.memory_space<vmem>>, %arg7: memref<1x16xf32, #tpu.memory_space<vmem>>, %arg8: memref<144x32xbf16, #tpu.memory_space<vmem>>, %arg9: memref<1x32xf32, #tpu.memory_space<vmem>>, %arg10: memref<288x32xbf16, #tpu.memory_space<vmem>>, %arg11: memref<1x32xf32, #tpu.memory_space<vmem>>, %arg12: memref<1x2x2x32xf32, #tpu.memory_space<vmem>>, %arg13: memref<18x24x16xf32, #tpu.memory_space<vmem>>, %arg14: memref<10x16x16xf32, #tpu.memory_space<vmem>>, %arg15: memref<6x12x32xf32, #tpu.memory_space<vmem>>) attributes {dimension_semantics = [#tpu.dimension_semantics<parallel>], iteration_bounds = array<i64: 2>, scalar_prefetch = 0 : i64, scratch_operands = 3 : i64, tpu.core_type = #tpu.core_type<tc>, window_params = [{transform_indices = @transform_0, window_bounds = array<i64: 1, 256, 27>}, {pipeline_mode = #tpu.pipeline_mode<synchronous>, transform_indices = @transform_1, window_bounds = array<i64: 27, 16>}, {pipeline_mode = #tpu.pipeline_mode<synchronous>, transform_indices = @transform_2, window_bounds = array<i64: 1, 16>}, {pipeline_mode = #tpu.pipeline_mode<synchronous>, transform_indices = @transform_3, window_bounds = array<i64: 144, 16>}, {pipeline_mode = #tpu.pipeline_mode<synchronous>, transform_indices = @transform_4, window_bounds = array<i64: 1, 16>}, {pipeline_mode = #tpu.pipeline_mode<synchronous>, transform_indices = @transform_5, window_bounds = array<i64: 16, 16>}, {pipeline_mode = #tpu.pipeline_mode<synchronous>, transform_indices = @transform_6, window_bounds = array<i64: 1, 16>}, {pipeline_mode = #tpu.pipeline_mode<synchronous>, transform_indices = @transform_7, window_bounds = array<i64: 144, 32>}, {pipeline_mode = #tpu.pipeline_mode<synchronous>, transform_indices = @transform_8, window_bounds = array<i64: 1, 32>}, {pipeline_mode = #tpu.pipeline_mode<synchronous>, transform_indices = @transform_9, window_bounds = array<i64: 288, 32>}, {pipeline_mode = #tpu.pipeline_mode<synchronous>, transform_indices = @transform_10, window_bounds = array<i64: 1, 32>}, {transform_indices = @transform_11, window_bounds = array<i64: 1, 2, 2, 32>}]} {
    %c0 = arith.constant 0 : index
    %c0_0 = arith.constant 0 : index
    %c0_1 = arith.constant 0 : index
    %0 = vector.load %arg1[%c0, %c0_0, %c0_1] : memref<1x256x27xbf16, #tpu.memory_space<vmem>>, vector<1x256x27xbf16>
    %1 = vector.shape_cast %0 : vector<1x256x27xbf16> to vector<256x27xbf16>
    %c0_2 = arith.constant 0 : index
    %c0_3 = arith.constant 0 : index
    %2 = vector.load %arg2[%c0_2, %c0_3] : memref<27x16xbf16, #tpu.memory_space<vmem>>, vector<27x16xbf16>
    %cst = arith.constant dense<0.000000e+00> : vector<256x16xf32>
    %3 = tpu.matmul %1, %2, %cst {dimension_numbers = #tpu.dot_dimension_numbers<[1], [0], [0], [1], [0, 0, 1, 1], [], []>} : vector<256x27xbf16>, vector<27x16xbf16>, vector<256x16xf32> -> vector<256x16xf32>
    %c0_4 = arith.constant 0 : index
    %c0_5 = arith.constant 0 : index
    %4 = vector.load %arg3[%c0_4, %c0_5] : memref<1x16xf32, #tpu.memory_space<vmem>>, vector<1x16xf32>
    %5 = vector.broadcast %4 : vector<1x16xf32> to vector<256x16xf32>
    %6 = arith.addf %3, %5 : vector<256x16xf32>
    %7 = vector.shape_cast %6 : vector<256x16xf32> to vector<16x16x16xf32>
    %cst_6 = arith.constant 0.000000e+00 : f32
    %8 = vector.broadcast %cst_6 : f32 to vector<18x24x16xf32>
    %c0_7 = arith.constant 0 : index
    %c0_8 = arith.constant 0 : index
    %c0_9 = arith.constant 0 : index
    %9 = vector.load %arg13[%c0_7, %c0_8, %c0_9] : memref<18x24x16xf32, #tpu.memory_space<vmem>>, vector<18x24x16xf32>
    tpu.vector_store %arg13[%c0_7, %c0_8, %c0_9], %8 {strides = array<i32>} : memref<18x24x16xf32, #tpu.memory_space<vmem>>, vector<18x24x16xf32>,
    %c1 = arith.constant 1 : index
    %c8 = arith.constant 8 : index
    %c0_10 = arith.constant 0 : index
    %10 = vector.load %arg13[%c1, %c8, %c0_10] : memref<18x24x16xf32, #tpu.memory_space<vmem>>, vector<16x16x16xf32>
    tpu.vector_store %arg13[%c1, %c8, %c0_10], %7 {strides = array<i32>} : memref<18x24x16xf32, #tpu.memory_space<vmem>>, vector<16x16x16xf32>,
    %c0_11 = arith.constant 0 : index
    %c7 = arith.constant 7 : index
    %c0_12 = arith.constant 0 : index
    %11 = tpu.strided_load %arg13[%c0_11, %c7, %c0_12] {strides = array<i32: 2, 2, 1>} : memref<18x24x16xf32, #tpu.memory_space<vmem>>, vector<8x8x16xf32>
    %12 = vector.shape_cast %11 : vector<8x8x16xf32> to vector<64x16xf32>
    %c0_13 = arith.constant 0 : index
    %c8_14 = arith.constant 8 : index
    %c0_15 = arith.constant 0 : index
    %13 = tpu.strided_load %arg13[%c0_13, %c8_14, %c0_15] {strides = array<i32: 2, 2, 1>} : memref<18x24x16xf32, #tpu.memory_space<vmem>>, vector<8x8x16xf32>
    %14 = vector.shape_cast %13 : vector<8x8x16xf32> to vector<64x16xf32>
    %c0_16 = arith.constant 0 : index
    %c9 = arith.constant 9 : index
    %c0_17 = arith.constant 0 : index
    %15 = tpu.strided_load %arg13[%c0_16, %c9, %c0_17] {strides = array<i32: 2, 2, 1>} : memref<18x24x16xf32, #tpu.memory_space<vmem>>, vector<8x8x16xf32>
    %16 = vector.shape_cast %15 : vector<8x8x16xf32> to vector<64x16xf32>
    %c1_18 = arith.constant 1 : index
    %c7_19 = arith.constant 7 : index
    %c0_20 = arith.constant 0 : index
    %17 = tpu.strided_load %arg13[%c1_18, %c7_19, %c0_20] {strides = array<i32: 2, 2, 1>} : memref<18x24x16xf32, #tpu.memory_space<vmem>>, vector<8x8x16xf32>
    %18 = vector.shape_cast %17 : vector<8x8x16xf32> to vector<64x16xf32>
    %c1_21 = arith.constant 1 : index
    %c8_22 = arith.constant 8 : index
    %c0_23 = arith.constant 0 : index
    %19 = tpu.strided_load %arg13[%c1_21, %c8_22, %c0_23] {strides = array<i32: 2, 2, 1>} : memref<18x24x16xf32, #tpu.memory_space<vmem>>, vector<8x8x16xf32>
    %20 = vector.shape_cast %19 : vector<8x8x16xf32> to vector<64x16xf32>
    %c1_24 = arith.constant 1 : index
    %c9_25 = arith.constant 9 : index
    %c0_26 = arith.constant 0 : index
    %21 = tpu.strided_load %arg13[%c1_24, %c9_25, %c0_26] {strides = array<i32: 2, 2, 1>} : memref<18x24x16xf32, #tpu.memory_space<vmem>>, vector<8x8x16xf32>
    %22 = vector.shape_cast %21 : vector<8x8x16xf32> to vector<64x16xf32>
    %c2 = arith.constant 2 : index
    %c7_27 = arith.constant 7 : index
    %c0_28 = arith.constant 0 : index
    %23 = tpu.strided_load %arg13[%c2, %c7_27, %c0_28] {strides = array<i32: 2, 2, 1>} : memref<18x24x16xf32, #tpu.memory_space<vmem>>, vector<8x8x16xf32>
    %24 = vector.shape_cast %23 : vector<8x8x16xf32> to vector<64x16xf32>
    %c2_29 = arith.constant 2 : index
    %c8_30 = arith.constant 8 : index
    %c0_31 = arith.constant 0 : index
    %25 = tpu.strided_load %arg13[%c2_29, %c8_30, %c0_31] {strides = array<i32: 2, 2, 1>} : memref<18x24x16xf32, #tpu.memory_space<vmem>>, vector<8x8x16xf32>
    %26 = vector.shape_cast %25 : vector<8x8x16xf32> to vector<64x16xf32>
    %c2_32 = arith.constant 2 : index
    %c9_33 = arith.constant 9 : index
    %c0_34 = arith.constant 0 : index
    %27 = tpu.strided_load %arg13[%c2_32, %c9_33, %c0_34] {strides = array<i32: 2, 2, 1>} : memref<18x24x16xf32, #tpu.memory_space<vmem>>, vector<8x8x16xf32>
    %28 = vector.shape_cast %27 : vector<8x8x16xf32> to vector<64x16xf32>
    %29 = tpu.concatenate %12, %14, %16, %18, %20, %22, %24, %26, %28 in 1 : vector<64x16xf32>, vector<64x16xf32>, vector<64x16xf32>, vector<64x16xf32>, vector<64x16xf32>, vector<64x16xf32>, vector<64x16xf32>, vector<64x16xf32>, vector<64x16xf32> -> vector<64x144xf32>
    %30 = arith.truncf %29 : vector<64x144xf32> to vector<64x144xbf16>
    %c0_35 = arith.constant 0 : index
    %c0_36 = arith.constant 0 : index
    %31 = vector.load %arg4[%c0_35, %c0_36] : memref<144x16xbf16, #tpu.memory_space<vmem>>, vector<144x16xbf16>
    %cst_37 = arith.constant dense<0.000000e+00> : vector<64x16xf32>
    %32 = tpu.matmul %30, %31, %cst_37 {dimension_numbers = #tpu.dot_dimension_numbers<[1], [0], [0], [1], [0, 0, 1, 1], [], []>} : vector<64x144xbf16>, vector<144x16xbf16>, vector<64x16xf32> -> vector<64x16xf32>
    %c0_38 = arith.constant 0 : index
    %c0_39 = arith.constant 0 : index
    %33 = vector.load %arg5[%c0_38, %c0_39] : memref<1x16xf32, #tpu.memory_space<vmem>>, vector<1x16xf32>
    %34 = vector.broadcast %33 : vector<1x16xf32> to vector<64x16xf32>
    %35 = arith.addf %32, %34 : vector<64x16xf32>
    %36 = math.absf %35 : vector<64x16xf32>
    %37 = arith.truncf %36 : vector<64x16xf32> to vector<64x16xbf16>
    %c0_40 = arith.constant 0 : index
    %c0_41 = arith.constant 0 : index
    %38 = vector.load %arg6[%c0_40, %c0_41] : memref<16x16xbf16, #tpu.memory_space<vmem>>, vector<16x16xbf16>
    %cst_42 = arith.constant dense<0.000000e+00> : vector<64x16xf32>
    %39 = tpu.matmul %37, %38, %cst_42 {dimension_numbers = #tpu.dot_dimension_numbers<[1], [0], [0], [1], [0, 0, 1, 1], [], []>} : vector<64x16xbf16>, vector<16x16xbf16>, vector<64x16xf32> -> vector<64x16xf32>
    %c0_43 = arith.constant 0 : index
    %c0_44 = arith.constant 0 : index
    %40 = vector.load %arg7[%c0_43, %c0_44] : memref<1x16xf32, #tpu.memory_space<vmem>>, vector<1x16xf32>
    %41 = vector.broadcast %40 : vector<1x16xf32> to vector<64x16xf32>
    %42 = arith.addf %39, %41 : vector<64x16xf32>
    %43 = tpu.reciprocal %42 : vector<64x16xf32> -> vector<64x16xf32>
    %44 = arith.mulf %35, %43 : vector<64x16xf32>
    %45 = vector.shape_cast %44 : vector<64x16xf32> to vector<8x8x16xf32>
    %cst_45 = arith.constant 0.000000e+00 : f32
    %46 = vector.broadcast %cst_45 : f32 to vector<10x16x16xf32>
    %c0_46 = arith.constant 0 : index
    %c0_47 = arith.constant 0 : index
    %c0_48 = arith.constant 0 : index
    %47 = vector.load %arg14[%c0_46, %c0_47, %c0_48] : memref<10x16x16xf32, #tpu.memory_space<vmem>>, vector<10x16x16xf32>
    tpu.vector_store %arg14[%c0_46, %c0_47, %c0_48], %46 {strides = array<i32>} : memref<10x16x16xf32, #tpu.memory_space<vmem>>, vector<10x16x16xf32>,
    %c1_49 = arith.constant 1 : index
    %c8_50 = arith.constant 8 : index
    %c0_51 = arith.constant 0 : index
    %48 = vector.load %arg14[%c1_49, %c8_50, %c0_51] : memref<10x16x16xf32, #tpu.memory_space<vmem>>, vector<8x8x16xf32>
    tpu.vector_store %arg14[%c1_49, %c8_50, %c0_51], %45 {strides = array<i32>} : memref<10x16x16xf32, #tpu.memory_space<vmem>>, vector<8x8x16xf32>,
    %c0_52 = arith.constant 0 : index
    %c7_53 = arith.constant 7 : index
    %c0_54 = arith.constant 0 : index
    %49 = tpu.strided_load %arg14[%c0_52, %c7_53, %c0_54] {strides = array<i32: 2, 2, 1>} : memref<10x16x16xf32, #tpu.memory_space<vmem>>, vector<4x4x16xf32>
    %50 = vector.shape_cast %49 : vector<4x4x16xf32> to vector<16x16xf32>
    %c0_55 = arith.constant 0 : index
    %c8_56 = arith.constant 8 : index
    %c0_57 = arith.constant 0 : index
    %51 = tpu.strided_load %arg14[%c0_55, %c8_56, %c0_57] {strides = array<i32: 2, 2, 1>} : memref<10x16x16xf32, #tpu.memory_space<vmem>>, vector<4x4x16xf32>
    %52 = vector.shape_cast %51 : vector<4x4x16xf32> to vector<16x16xf32>
    %c0_58 = arith.constant 0 : index
    %c9_59 = arith.constant 9 : index
    %c0_60 = arith.constant 0 : index
    %53 = tpu.strided_load %arg14[%c0_58, %c9_59, %c0_60] {strides = array<i32: 2, 2, 1>} : memref<10x16x16xf32, #tpu.memory_space<vmem>>, vector<4x4x16xf32>
    %54 = vector.shape_cast %53 : vector<4x4x16xf32> to vector<16x16xf32>
    %c1_61 = arith.constant 1 : index
    %c7_62 = arith.constant 7 : index
    %c0_63 = arith.constant 0 : index
    %55 = tpu.strided_load %arg14[%c1_61, %c7_62, %c0_63] {strides = array<i32: 2, 2, 1>} : memref<10x16x16xf32, #tpu.memory_space<vmem>>, vector<4x4x16xf32>
    %56 = vector.shape_cast %55 : vector<4x4x16xf32> to vector<16x16xf32>
    %c1_64 = arith.constant 1 : index
    %c8_65 = arith.constant 8 : index
    %c0_66 = arith.constant 0 : index
    %57 = tpu.strided_load %arg14[%c1_64, %c8_65, %c0_66] {strides = array<i32: 2, 2, 1>} : memref<10x16x16xf32, #tpu.memory_space<vmem>>, vector<4x4x16xf32>
    %58 = vector.shape_cast %57 : vector<4x4x16xf32> to vector<16x16xf32>
    %c1_67 = arith.constant 1 : index
    %c9_68 = arith.constant 9 : index
    %c0_69 = arith.constant 0 : index
    %59 = tpu.strided_load %arg14[%c1_67, %c9_68, %c0_69] {strides = array<i32: 2, 2, 1>} : memref<10x16x16xf32, #tpu.memory_space<vmem>>, vector<4x4x16xf32>
    %60 = vector.shape_cast %59 : vector<4x4x16xf32> to vector<16x16xf32>
    %c2_70 = arith.constant 2 : index
    %c7_71 = arith.constant 7 : index
    %c0_72 = arith.constant 0 : index
    %61 = tpu.strided_load %arg14[%c2_70, %c7_71, %c0_72] {strides = array<i32: 2, 2, 1>} : memref<10x16x16xf32, #tpu.memory_space<vmem>>, vector<4x4x16xf32>
    %62 = vector.shape_cast %61 : vector<4x4x16xf32> to vector<16x16xf32>
    %c2_73 = arith.constant 2 : index
    %c8_74 = arith.constant 8 : index
    %c0_75 = arith.constant 0 : index
    %63 = tpu.strided_load %arg14[%c2_73, %c8_74, %c0_75] {strides = array<i32: 2, 2, 1>} : memref<10x16x16xf32, #tpu.memory_space<vmem>>, vector<4x4x16xf32>
    %64 = vector.shape_cast %63 : vector<4x4x16xf32> to vector<16x16xf32>
    %c2_76 = arith.constant 2 : index
    %c9_77 = arith.constant 9 : index
    %c0_78 = arith.constant 0 : index
    %65 = tpu.strided_load %arg14[%c2_76, %c9_77, %c0_78] {strides = array<i32: 2, 2, 1>} : memref<10x16x16xf32, #tpu.memory_space<vmem>>, vector<4x4x16xf32>
    %66 = vector.shape_cast %65 : vector<4x4x16xf32> to vector<16x16xf32>
    %67 = tpu.concatenate %50, %52, %54, %56, %58, %60, %62, %64, %66 in 1 : vector<16x16xf32>, vector<16x16xf32>, vector<16x16xf32>, vector<16x16xf32>, vector<16x16xf32>, vector<16x16xf32>, vector<16x16xf32>, vector<16x16xf32>, vector<16x16xf32> -> vector<16x144xf32>
    %68 = arith.truncf %67 : vector<16x144xf32> to vector<16x144xbf16>
    %c0_79 = arith.constant 0 : index
    %c0_80 = arith.constant 0 : index
    %69 = vector.load %arg8[%c0_79, %c0_80] : memref<144x32xbf16, #tpu.memory_space<vmem>>, vector<144x32xbf16>
    %cst_81 = arith.constant dense<0.000000e+00> : vector<16x32xf32>
    %70 = tpu.matmul %68, %69, %cst_81 {dimension_numbers = #tpu.dot_dimension_numbers<[1], [0], [0], [1], [0, 0, 1, 1], [], []>} : vector<16x144xbf16>, vector<144x32xbf16>, vector<16x32xf32> -> vector<16x32xf32>
    %c0_82 = arith.constant 0 : index
    %c0_83 = arith.constant 0 : index
    %71 = vector.load %arg9[%c0_82, %c0_83] : memref<1x32xf32, #tpu.memory_space<vmem>>, vector<1x32xf32>
    %72 = vector.broadcast %71 : vector<1x32xf32> to vector<16x32xf32>
    %73 = arith.addf %70, %72 : vector<16x32xf32>
    %74 = vector.shape_cast %73 : vector<16x32xf32> to vector<4x4x32xf32>
    %cst_84 = arith.constant 0.000000e+00 : f32
    %75 = vector.broadcast %cst_84 : f32 to vector<6x12x32xf32>
    %c0_85 = arith.constant 0 : index
    %c0_86 = arith.constant 0 : index
    %c0_87 = arith.constant 0 : index
    %76 = vector.load %arg15[%c0_85, %c0_86, %c0_87] : memref<6x12x32xf32, #tpu.memory_space<vmem>>, vector<6x12x32xf32>
    tpu.vector_store %arg15[%c0_85, %c0_86, %c0_87], %75 {strides = array<i32>} : memref<6x12x32xf32, #tpu.memory_space<vmem>>, vector<6x12x32xf32>,
    %c1_88 = arith.constant 1 : index
    %c8_89 = arith.constant 8 : index
    %c0_90 = arith.constant 0 : index
    %77 = vector.load %arg15[%c1_88, %c8_89, %c0_90] : memref<6x12x32xf32, #tpu.memory_space<vmem>>, vector<4x4x32xf32>
    tpu.vector_store %arg15[%c1_88, %c8_89, %c0_90], %74 {strides = array<i32>} : memref<6x12x32xf32, #tpu.memory_space<vmem>>, vector<4x4x32xf32>,
    %c0_91 = arith.constant 0 : index
    %c7_92 = arith.constant 7 : index
    %c0_93 = arith.constant 0 : index
    %78 = tpu.strided_load %arg15[%c0_91, %c7_92, %c0_93] {strides = array<i32: 2, 2, 1>} : memref<6x12x32xf32, #tpu.memory_space<vmem>>, vector<2x2x32xf32>
    %79 = vector.shape_cast %78 : vector<2x2x32xf32> to vector<4x32xf32>
    %c0_94 = arith.constant 0 : index
    %c8_95 = arith.constant 8 : index
    %c0_96 = arith.constant 0 : index
    %80 = tpu.strided_load %arg15[%c0_94, %c8_95, %c0_96] {strides = array<i32: 2, 2, 1>} : memref<6x12x32xf32, #tpu.memory_space<vmem>>, vector<2x2x32xf32>
    %81 = vector.shape_cast %80 : vector<2x2x32xf32> to vector<4x32xf32>
    %c0_97 = arith.constant 0 : index
    %c9_98 = arith.constant 9 : index
    %c0_99 = arith.constant 0 : index
    %82 = tpu.strided_load %arg15[%c0_97, %c9_98, %c0_99] {strides = array<i32: 2, 2, 1>} : memref<6x12x32xf32, #tpu.memory_space<vmem>>, vector<2x2x32xf32>
    %83 = vector.shape_cast %82 : vector<2x2x32xf32> to vector<4x32xf32>
    %c1_100 = arith.constant 1 : index
    %c7_101 = arith.constant 7 : index
    %c0_102 = arith.constant 0 : index
    %84 = tpu.strided_load %arg15[%c1_100, %c7_101, %c0_102] {strides = array<i32: 2, 2, 1>} : memref<6x12x32xf32, #tpu.memory_space<vmem>>, vector<2x2x32xf32>
    %85 = vector.shape_cast %84 : vector<2x2x32xf32> to vector<4x32xf32>
    %c1_103 = arith.constant 1 : index
    %c8_104 = arith.constant 8 : index
    %c0_105 = arith.constant 0 : index
    %86 = tpu.strided_load %arg15[%c1_103, %c8_104, %c0_105] {strides = array<i32: 2, 2, 1>} : memref<6x12x32xf32, #tpu.memory_space<vmem>>, vector<2x2x32xf32>
    %87 = vector.shape_cast %86 : vector<2x2x32xf32> to vector<4x32xf32>
    %c1_106 = arith.constant 1 : index
    %c9_107 = arith.constant 9 : index
    %c0_108 = arith.constant 0 : index
    %88 = tpu.strided_load %arg15[%c1_106, %c9_107, %c0_108] {strides = array<i32: 2, 2, 1>} : memref<6x12x32xf32, #tpu.memory_space<vmem>>, vector<2x2x32xf32>
    %89 = vector.shape_cast %88 : vector<2x2x32xf32> to vector<4x32xf32>
    %c2_109 = arith.constant 2 : index
    %c7_110 = arith.constant 7 : index
    %c0_111 = arith.constant 0 : index
    %90 = tpu.strided_load %arg15[%c2_109, %c7_110, %c0_111] {strides = array<i32: 2, 2, 1>} : memref<6x12x32xf32, #tpu.memory_space<vmem>>, vector<2x2x32xf32>
    %91 = vector.shape_cast %90 : vector<2x2x32xf32> to vector<4x32xf32>
    %c2_112 = arith.constant 2 : index
    %c8_113 = arith.constant 8 : index
    %c0_114 = arith.constant 0 : index
    %92 = tpu.strided_load %arg15[%c2_112, %c8_113, %c0_114] {strides = array<i32: 2, 2, 1>} : memref<6x12x32xf32, #tpu.memory_space<vmem>>, vector<2x2x32xf32>
    %93 = vector.shape_cast %92 : vector<2x2x32xf32> to vector<4x32xf32>
    %c2_115 = arith.constant 2 : index
    %c9_116 = arith.constant 9 : index
    %c0_117 = arith.constant 0 : index
    %94 = tpu.strided_load %arg15[%c2_115, %c9_116, %c0_117] {strides = array<i32: 2, 2, 1>} : memref<6x12x32xf32, #tpu.memory_space<vmem>>, vector<2x2x32xf32>
    %95 = vector.shape_cast %94 : vector<2x2x32xf32> to vector<4x32xf32>
    %96 = tpu.concatenate %79, %81, %83, %85, %87, %89, %91, %93, %95 in 1 : vector<4x32xf32>, vector<4x32xf32>, vector<4x32xf32>, vector<4x32xf32>, vector<4x32xf32>, vector<4x32xf32>, vector<4x32xf32>, vector<4x32xf32>, vector<4x32xf32> -> vector<4x288xf32>
    %97 = arith.truncf %96 : vector<4x288xf32> to vector<4x288xbf16>
    %c0_118 = arith.constant 0 : index
    %c0_119 = arith.constant 0 : index
    %98 = vector.load %arg10[%c0_118, %c0_119] : memref<288x32xbf16, #tpu.memory_space<vmem>>, vector<288x32xbf16>
    %cst_120 = arith.constant dense<0.000000e+00> : vector<4x32xf32>
    %99 = tpu.matmul %97, %98, %cst_120 {dimension_numbers = #tpu.dot_dimension_numbers<[1], [0], [0], [1], [0, 0, 1, 1], [], []>} : vector<4x288xbf16>, vector<288x32xbf16>, vector<4x32xf32> -> vector<4x32xf32>
    %c0_121 = arith.constant 0 : index
    %c0_122 = arith.constant 0 : index
    %100 = vector.load %arg11[%c0_121, %c0_122] : memref<1x32xf32, #tpu.memory_space<vmem>>, vector<1x32xf32>
    %101 = vector.broadcast %100 : vector<1x32xf32> to vector<4x32xf32>
    %102 = arith.addf %99, %101 : vector<4x32xf32>
    %103 = vector.shape_cast %102 : vector<4x32xf32> to vector<2x2x32xf32>
    %c0_123 = arith.constant 0 : index
    %c0_124 = arith.constant 0 : index
    %c0_125 = arith.constant 0 : index
    %c0_126 = arith.constant 0 : index
    %104 = vector.load %arg12[%c0_123, %c0_124, %c0_125, %c0_126] : memref<1x2x2x32xf32, #tpu.memory_space<vmem>>, vector<1x2x2x32xf32>
    %105 = vector.shape_cast %104 : vector<1x2x2x32xf32> to vector<2x2x32xf32>
    %106 = vector.shape_cast %103 : vector<2x2x32xf32> to vector<1x2x2x32xf32>
    tpu.vector_store %arg12[%c0_123, %c0_124, %c0_125, %c0_126], %106 {strides = array<i32>} : memref<1x2x2x32xf32, #tpu.memory_space<vmem>>, vector<1x2x2x32xf32>,
    return
  }
  func.func @transform_0(%arg0: i32) -> (i32, i32, i32) {
    %c0_i32 = arith.constant 0 : i32
    %c0_i32_0 = arith.constant 0 : i32
    %c0_i32_1 = arith.constant 0 : i32
    return %arg0, %c0_i32, %c0_i32_0 : i32, i32, i32
  }
  func.func @transform_1(%arg0: i32) -> (i32, i32) {
    %c0_i32 = arith.constant 0 : i32
    %c0_i32_0 = arith.constant 0 : i32
    %c0_i32_1 = arith.constant 0 : i32
    return %c0_i32, %c0_i32_0 : i32, i32
  }
  func.func @transform_2(%arg0: i32) -> (i32, i32) {
    %c0_i32 = arith.constant 0 : i32
    %c0_i32_0 = arith.constant 0 : i32
    %c0_i32_1 = arith.constant 0 : i32
    return %c0_i32, %c0_i32_0 : i32, i32
  }
  func.func @transform_3(%arg0: i32) -> (i32, i32) {
    %c0_i32 = arith.constant 0 : i32
    %c0_i32_0 = arith.constant 0 : i32
    %c0_i32_1 = arith.constant 0 : i32
    return %c0_i32, %c0_i32_0 : i32, i32
  }
  func.func @transform_4(%arg0: i32) -> (i32, i32) {
    %c0_i32 = arith.constant 0 : i32
    %c0_i32_0 = arith.constant 0 : i32
    %c0_i32_1 = arith.constant 0 : i32
    return %c0_i32, %c0_i32_0 : i32, i32
  }
  func.func @transform_5(%arg0: i32) -> (i32, i32) {
    %c0_i32 = arith.constant 0 : i32
    %c0_i32_0 = arith.constant 0 : i32
    %c0_i32_1 = arith.constant 0 : i32
    return %c0_i32, %c0_i32_0 : i32, i32
  }
  func.func @transform_6(%arg0: i32) -> (i32, i32) {
    %c0_i32 = arith.constant 0 : i32
    %c0_i32_0 = arith.constant 0 : i32
    %c0_i32_1 = arith.constant 0 : i32
    return %c0_i32, %c0_i32_0 : i32, i32
  }
  func.func @transform_7(%arg0: i32) -> (i32, i32) {
    %c0_i32 = arith.constant 0 : i32
    %c0_i32_0 = arith.constant 0 : i32
    %c0_i32_1 = arith.constant 0 : i32
    return %c0_i32, %c0_i32_0 : i32, i32
  }
  func.func @transform_8(%arg0: i32) -> (i32, i32) {
    %c0_i32 = arith.constant 0 : i32
    %c0_i32_0 = arith.constant 0 : i32
    %c0_i32_1 = arith.constant 0 : i32
    return %c0_i32, %c0_i32_0 : i32, i32
  }
  func.func @transform_9(%arg0: i32) -> (i32, i32) {
    %c0_i32 = arith.constant 0 : i32
    %c0_i32_0 = arith.constant 0 : i32
    %c0_i32_1 = arith.constant 0 : i32
    return %c0_i32, %c0_i32_0 : i32, i32
  }
  func.func @transform_10(%arg0: i32) -> (i32, i32) {
    %c0_i32 = arith.constant 0 : i32
    %c0_i32_0 = arith.constant 0 : i32
    %c0_i32_1 = arith.constant 0 : i32
    return %c0_i32, %c0_i32_0 : i32, i32
  }
  func.func @transform_11(%arg0: i32) -> (i32, i32, i32, i32) {
    %c0_i32 = arith.constant 0 : i32
    %c0_i32_0 = arith.constant 0 : i32
    %c0_i32_1 = arith.constant 0 : i32
    %c0_i32_2 = arith.constant 0 : i32
    return %arg0, %c0_i32, %c0_i32_0, %c0_i32_1 : i32, i32, i32, i32
  }
}

</mosaic_0001>

<bundles_post_ra>
// kernel: tpu_custom_call.1
= control target key start
LH: loop header
LB: loop body
LE: loop exit
PB: predicated region body
PF: predicated region fallthrough
CT: control target
= control target key end

     0   :  { %s3819_s0 = inlined_call_operand.vmem [shape: bf16[2,256,27], index: 0, kind: input, shape index: {}]   ;;  %s3820_s1 = inlined_call_operand.vmem [shape: bf16[27,16], index: 1, kind: input, shape index: {}]   ;;  %s3821_s2 = inlined_call_operand.vmem [shape: f32[1,16], index: 2, kind: input, shape index: {}]   ;;  %s3822_s3 = inlined_call_operand.vmem [shape: bf16[144,16], index: 3, kind: input, shape index: {}]   ;;  %s3823_s4 = inlined_call_operand.vmem [shape: f32[1,16], index: 4, kind: input, shape index: {}]   ;;  %s3824_s5 = inlined_call_operand.vmem [shape: bf16[16,16], index: 5, kind: input, shape index: {}]   ;;  %s3825_s6 = inlined_call_operand.vmem [shape: f32[1,16], index: 6, kind: input, shape index: {}]   ;;  %s3826_s7 = inlined_call_operand.vmem [shape: bf16[144,32], index: 7, kind: input, shape index: {}]   ;;  %s3827_s8 = inlined_call_operand.vmem [shape: f32[1,32], index: 8, kind: input, shape index: {}]   ;;  %s3828_s9 = inlined_call_operand.vmem [shape: bf16[288,32], index: 9, kind: input, shape index: {}]   ;;  %s3829_s10 = inlined_call_operand.vmem [shape: f32[1,32], index: 10, kind: input, shape index: {}]   ;;  %s3830_s11 = inlined_call_operand.hbm [shape: f32[2,2,2,32], index: 11, kind: output, shape index: {}]  }
   0x1   :  { %3839 = sst [smem:[#allocation8_spill]] %s3819_s0 }
   0x2   :  { %3840 = sst [smem:[#allocation9_spill]] %s3820_s1 }
   0x3   :  { %16 = vsyncpa [#allocation6], 0 }
   0x4   :  { %18 = vsyncpa [#allocation6 + $0x1], 0  ;;  %s3123_s17 = smov 0   ;;  %s3125_s18 = smov 0  }
   0x5   :  { %s3127_s19 = smov 0   ;;  %s3129_s20 = smov 0  }
   0x6 LB: > { %s3144_s21 = sadd.s32 4294967295, %s3047_s20   ;;  %s2470_s22 = sadd.s32 4294967294, %s3047_s20   ;;  %s3047_s20 = sphi %s3129_s20, %s3854_s20   ;;  %s3043_s19 = sphi %s3127_s19, %s3853_s19   ;;  %s3039_s18 = sphi %s3125_s18, %s3852_s18   ;;  %s3035_s17 = sphi %s3123_s17, %s3851_s17  }
   0x7   : > { %s3148_s23 = sadd.s32 1, %s3047_s20   ;;  %s267_s24 = sadd.s32 1, %s3043_s19 }
   0x8   : > { %s264_s25 = ssub.s32 %s3047_s20, %s3148_s23  ;;  %p277_p0 = scmp.ne.s32.totalorder %s3043_s19, %s3039_s18 }
   0x9   : > { %p265_p1 = scmp.eq.s32.totalorder %s264_s25, 0  ;;  %p278_p2 = scmp.eq.s32.totalorder %s3144_s21, 1 }
   0xa   : > { %p283_p3 = scmp.ne.s32.totalorder %s3039_s18, %s3035_s17  ;;  %p284_p4 = scmp.eq.s32.totalorder %s2470_s22, 1 }
   0xb   : > { %s3159_s26 = scalar_select %p265_p1, %s3043_s19, %s267_s24  }
   0xc   : > { %p3161_p5 = por %p278_p2, %p277_p0  ;;  %p3165_p6 = por %p284_p4, %p283_p3 }
   0xd   : > { %p2473_p7 = scmp.ge.s32.totalorder %s3047_s20, 1  ;;  %p340_p8 = scmp.lt.s32.totalorder %s3047_s20, 3 }
   0xf   : > { %p341_p9 = pnand %p2473_p7, %p340_p8 }
  0x10   : > { %s3843_s1 = sld [smem:[#allocation9_spill]] (!%p341_p9)  ;;  %vm569_vm0 = vcmask (!%p341_p9), 1044480   ;;  %vm570_vm1 = vcmask (!%p341_p9), 1045504   ;;  %p380_p10 = scmp.lt.s32.totalorder (!%p341_p9), %s3144_s21, 1  ;;  %v3049_v2 = vmov (!%p341_p9), 65535   ;;  %vm520_vm2 = vcmask (!%p341_p9), 220160  }
  0x11   : > { %344 = sbr.rel (%p341_p9) target bundleno = 1629 (0x65d), region = 64  ;;  %v571_v3 = vsel (!%p341_p9), %vm569_vm0, 4294967295, %v3049_v2  ;;  %s3844_s0 = sld [smem:[#allocation8_spill]] (!%p341_p9)  ;;  %vm737_vm3 = vcmask (!%p341_p9), 130048   ;;  %v3050_v22 = vmov (!%p341_p9), 0.0   ;;  %v2932_v23 = vld [vmem:[%s3822_s3] sm:$0xff] (!%p341_p9)  }
  0x12   : > { %v572_v4 = vsel (!%p341_p9), %vm570_vm1, %v571_v3, 0  ;;  %745 = vst.msk [vmem:[#allocation2 + $0x38] sm:$0xff] (!%p341_p9), %vm737_vm3, %v3050_v22  ;;  %738 = vst.msk [vmem:[#allocation2] sm:$0xff] (!%p341_p9), %vm737_vm3, %v3050_v22  ;;  %v3051_v24 = vmov (!%p341_p9), 0   ;;  %v2933_v25 = vld [vmem:[%s3822_s3 + $0x8] sm:$0xff] (!%p341_p9)   ;;  %v2934_v26 = vld [vmem:[%s3822_s3 + $0x10] sm:$0xff] (!%p341_p9)  }
  0x13   : > { %739 = vst.msk [vmem:[#allocation2 + $0x8] sm:$0xff] (!%p341_p9), %vm737_vm3, %v3050_v22  ;;  %740 = vst.msk [vmem:[#allocation2 + $0x10] sm:$0xff] (!%p341_p9), %vm737_vm3, %v3050_v22  ;;  %1355 = vmatprep.subr.bf16.mxu1 (!%p341_p9), %v3051_v24  ;;  %v3371_v27 = vld [vmem:[%s3821_s2] ss:$0 sm:$0xff] (!%p341_p9)  ;;  %v2935_v35 = vld [vmem:[%s3822_s3 + $0x18] sm:$0xff] (!%p341_p9)   ;;  %vm1202_vm4 = vcmask (!%p341_p9), 261120  }
  0x14   : > { %741 = vst.msk [vmem:[#allocation2 + $0x18] sm:$0xff] (!%p341_p9), %vm737_vm3, %v3050_v22  ;;  %742 = vst.msk [vmem:[#allocation2 + $0x20] sm:$0xff] (!%p341_p9), %vm737_vm3, %v3050_v22  ;;  %1356 = vmatpush1.bf16.msra.mxu1 (!%p341_p9), %v2932_v23  ;;  %v2936_v37 = vld [vmem:[%s3822_s3 + $0x20] sm:$0xff] (!%p341_p9)   ;;  %v2937_v46 = vld [vmem:[%s3822_s3 + $0x28] sm:$0xff] (!%p341_p9)   ;;  %s3835_s13 = smov (!%p341_p9), 16   ;;  %s3836_s16 = smov (!%p341_p9), 32  }
  0x15   : > { %743 = vst.msk [vmem:[#allocation2 + $0x28] sm:$0xff] (!%p341_p9), %vm737_vm3, %v3050_v22  ;;  %744 = vst.msk [vmem:[#allocation2 + $0x30] sm:$0xff] (!%p341_p9), %vm737_vm3, %v3050_v22  ;;  %1357 = vmatprep.subr.bf16.mxu1 (!%p341_p9), %v3051_v24  ;;  %v2938_v52 = vld [vmem:[%s3822_s3 + $0x30] sm:$0xff] (!%p341_p9)   ;;  %s3831_s25 = smov (!%p341_p9), 112   ;;  %s3833_s12 = smov (!%p341_p9), 96   ;;  %vm1211_vm5 = vcmask (!%p341_p9), 392192  }
  0x16   : > { %v2914_v0 = vld [vmem:[%s3843_s1] sm:$0xff] (!%p341_p9)   ;;  %v2915_v1 = vld [vmem:[%s3843_s1 + $0x8] sm:$0x3f] (!%p341_p9)   ;;  %746 = vst.msk [vmem:[#allocation2 + $0x40] sm:$0xff] (!%p341_p9), %vm737_vm3, %v3050_v22  ;;  %747 = vst.msk [vmem:[#allocation2 + $0x48] sm:$0xff] (!%p341_p9), %vm737_vm3, %v3050_v22  ;;  %s3838_s22 = smov (!%p341_p9), 64  }
  0x17   : > { %2618 = vmatprep.subr.bf16.mxu0 (!%p341_p9), %v2914_v0  ;;  %v574_v5 = vand.u32 (!%p341_p9), %v2915_v1, %v572_v4  ;;  %748 = vst.msk [vmem:[#allocation2 + $0x50] sm:$0xff] (!%p341_p9), %vm737_vm3, %v3050_v22  ;;  %749 = vst.msk [vmem:[#allocation2 + $0x58] sm:$0xff] (!%p341_p9), %vm737_vm3, %v3050_v22  ;;  %vm1220_vm6 = vcmask (!%p341_p9), 523264   ;;  %vm1229_vm7 = vcmask (!%p341_p9), 654336   ;;  %vm1238_vm8 = vcmask (!%p341_p9), 785408   ;;  %s3849_s30 = smov (!%p341_p9), 112  }
  0x18   : > { %2619 = vmatpush3.bf16.msra.mxu0 %v2914_v0  ;;  %s381_s14 = scalar_select %p380_p10, %s3144_s21, 1  ;;  %750 = vst.msk [vmem:[#allocation2 + $0x60] sm:$0xff] %vm737_vm3, %v3050_v22  ;;  %751 = vst.msk [vmem:[#allocation2 + $0x68] sm:$0xff] %vm737_vm3, %v3050_v22  ;;  %1358 = vmatpush1.bf16.msra.mxu1 %v2933_v25  ;;  %v2939_v0 = vld [vmem:[%s3822_s3 + $0x38] sm:$0xff]   ;;  %vm1247_vm9 = vcmask 916480   ;;  %vm1888_vm10 = vcmask 257024  }
  0x19   : > { %2620 = vmatprep.subr.bf16.mxu0 %v574_v5  ;;  %752 = vst.msk [vmem:[#allocation2 + $0x70] sm:$0xff] %vm737_vm3, %v3050_v22  ;;  %753 = vst.msk [vmem:[#allocation2 + $0x78] sm:$0xff] %vm737_vm3, %v3050_v22  ;;  %1359 = vmatprep.subr.bf16.mxu1 %v3051_v24  ;;  %vm3059_vm11 = vmmov 0   ;;  %vm2307_vm12 = vcmask 254976  }
  0x1a   : > { %s2568_s15 = sshll.u32 %s381_s14, 7  ;;  %754 = vst.msk [vmem:[#allocation2 + $0x80] sm:$0xff] %vm737_vm3, %v3050_v22  ;;  %755 = vst.msk [vmem:[#allocation2 + $0x88] sm:$0xff] %vm737_vm3, %v3050_v22  ;;  %v842_v43 = vld [vmem:[#allocation2 + $0x8] ss:$2 sm:$0xff]  ;;  %s3832_s14 = smov 80  }
  0x1b   : > { %s3182_s24 = scalar_lea.vmem %s3844_s0, %s2568_s15  ;;  %756 = vst.msk [vmem:[#allocation2 + $0x90] sm:$0xff] %vm737_vm3, %v3050_v22  ;;  %757 = vst.msk [vmem:[#allocation2 + $0x98] sm:$0xff] %vm737_vm3, %v3050_v22  ;;  %v858_v50 = vld [vmem:[#allocation2 + $0x9] ss:$2 sm:$0xff]  ;;  %s3057_s15 = smov 48  }
  0x1c   : > { %2621 = vmatpush3.bf16.msra.mxu0 %v574_v5  ;;  %v2916_v6 = vld [vmem:[%s3182_s24] sm:$0xff]   ;;  %v2917_v7 = vld [vmem:[%s3182_s24 + $0x8] sm:$0xff]   ;;  %v2918_v8 = vld [vmem:[%s3182_s24 + $0x10] sm:$0xff]   ;;  %758 = vst.msk [vmem:[#allocation2 + $0xa0] sm:$0xff] %vm737_vm3, %v3050_v22  ;;  %1360 = vmatpush1.bf16.msra.mxu1 %v2934_v26  ;;  %s2569_s0 = sshll.u32 %s3144_s21, 6 }
  0x1d   : > { %2622 = vmatprep.mubr.msk.bf16.mxu0 %vm520_vm2, %v2916_v6  ;;  %v2919_v9 = vld [vmem:[%s3182_s24 + $0x18] sm:$0xff]   ;;  %v2920_v10 = vld [vmem:[%s3182_s24 + $0x20] sm:$0xff]   ;;  %v2921_v11 = vld [vmem:[%s3182_s24 + $0x28] sm:$0xff]   ;;  %759 = vst.msk [vmem:[#allocation2 + $0xa8] sm:$0xff] %vm737_vm3, %v3050_v22  ;;  %1840 = vmatprep.subr.bf16.mxu0 %v3051_v24 }
  0x1e   : > { %v2922_v12 = vld [vmem:[%s3182_s24 + $0x30] sm:$0xff]   ;;  %v2923_v13 = vld [vmem:[%s3182_s24 + $0x38] sm:$0xff]   ;;  %v2924_v14 = vld [vmem:[%s3182_s24 + $0x40] sm:$0xff]   ;;  %760 = vst.msk [vmem:[#allocation2 + $0xb0] sm:$0xff] %vm737_vm3, %v3050_v22  ;;  %1361 = vmatprep.subr.bf16.mxu1 %v3051_v24 }
  0x1f   : > { %2623 = vmatmul.mubr.msk.bf16.vlgmr.msra.gmra.mrb[0].mxu0 %vm520_vm2, %v2917_v7  ;;  %v2925_v15 = vld [vmem:[%s3182_s24 + $0x48] sm:$0xff]   ;;  %v2926_v16 = vld [vmem:[%s3182_s24 + $0x50] sm:$0xff]   ;;  %v2927_v17 = vld [vmem:[%s3182_s24 + $0x58] sm:$0xff]   ;;  %761 = vst.msk [vmem:[#allocation2 + $0xb8] sm:$0xff] %vm737_vm3, %v3050_v22 }
  0x20   : > { %2626 = vmatprep.mubr.msk.bf16.mxu0 %vm520_vm2, %v2918_v8  ;;  %v2928_v18 = vld [vmem:[%s3182_s24 + $0x60] sm:$0xff]   ;;  %v2929_v19 = vld [vmem:[%s3182_s24 + $0x68] sm:$0xff]   ;;  %v2930_v20 = vld [vmem:[%s3182_s24 + $0x70] sm:$0xff]   ;;  %762 = vst.msk [vmem:[#allocation2 + $0xc0] sm:$0xff] %vm737_vm3, %v3050_v22  ;;  %1362 = vmatpush1.bf16.msra.mxu1 %v2935_v35 }
  0x21   : > { %v2931_v21 = vld [vmem:[%s3182_s24 + $0x78] sm:$0xff]   ;;  %763 = vst.msk [vmem:[#allocation2 + $0xc8] sm:$0xff] %vm737_vm3, %v3050_v22  ;;  %764 = vst.msk [vmem:[#allocation2 + $0xd0] sm:$0xff] %vm737_vm3, %v3050_v22  ;;  %1363 = vmatprep.subr.bf16.mxu1 %v3051_v24 }
  0x22   : > { %765 = vst.msk [vmem:[#allocation2 + $0xd8] sm:$0xff] %vm737_vm3, %v3050_v22  ;;  %766 = vst.msk [vmem:[#allocation2 + $0xe0] sm:$0xff] %vm737_vm3, %v3050_v22 }
  0x23   : > { %767 = vst.msk [vmem:[#allocation2 + $0xe8] sm:$0xff] %vm737_vm3, %v3050_v22  ;;  %768 = vst.msk [vmem:[#allocation2 + $0xf0] sm:$0xff] %vm737_vm3, %v3050_v22 }
  0x24   : > { %769 = vst.msk [vmem:[#allocation2 + $0xf8] sm:$0xff] %vm737_vm3, %v3050_v22  ;;  %770 = vst.msk [vmem:[#allocation2 + $0x100] sm:$0xff] %vm737_vm3, %v3050_v22  ;;  %1364 = vmatpush1.bf16.msra.mxu1 %v2936_v37 }
  0x25   : > { %771 = vst.msk [vmem:[#allocation2 + $0x108] sm:$0xff] %vm737_vm3, %v3050_v22  ;;  %772 = vst.msk [vmem:[#allocation2 + $0x110] sm:$0xff] %vm737_vm3, %v3050_v22  ;;  %1365 = vmatprep.subr.bf16.mxu1 %v3051_v24 }
  0x26   : > { %773 = vst.msk [vmem:[#allocation2 + $0x118] sm:$0xff] %vm737_vm3, %v3050_v22  ;;  %774 = vst.msk [vmem:[#allocation2 + $0x120] sm:$0xff] %vm737_vm3, %v3050_v22 }
  0x27   : > { %2627 = vmatmul.mubr.msk.bf16.gmra.mrb[4].mxu0 %vm520_vm2, %v2919_v9  ;;  %775 = vst.msk [vmem:[#allocation2 + $0x128] sm:$0xff] %vm737_vm3, %v3050_v22  ;;  %776 = vst.msk [vmem:[#allocation2 + $0x130] sm:$0xff] %vm737_vm3, %v3050_v22 }
  0x28   : > { %2630 = vmatprep.mubr.msk.bf16.mxu0 %vm520_vm2, %v2920_v10  ;;  %777 = vst.msk [vmem:[#allocation2 + $0x138] sm:$0xff] %vm737_vm3, %v3050_v22  ;;  %778 = vst.msk [vmem:[#allocation2 + $0x140] sm:$0xff] %vm737_vm3, %v3050_v22  ;;  %1366 = vmatpush1.bf16.msra.mxu1 %v2937_v46  ;;  %v2940_v10 = vld [vmem:[%s3822_s3 + $0x40] sm:$0xff]  }
  0x29   : > { %779 = vst.msk [vmem:[#allocation2 + $0x148] sm:$0xff] %vm737_vm3, %v3050_v22  ;;  %780 = vst.msk [vmem:[#allocation2 + $0x150] sm:$0xff] %vm737_vm3, %v3050_v22  ;;  %1367 = vmatprep.subr.bf16.mxu1 %v3051_v24 }
  0x2a   : > { %781 = vst.msk [vmem:[#allocation2 + $0x158] sm:$0xff] %vm737_vm3, %v3050_v22  ;;  %782 = vst.msk [vmem:[#allocation2 + $0x160] sm:$0xff] %vm737_vm3, %v3050_v22 }
  0x2b   : > { %783 = vst.msk [vmem:[#allocation2 + $0x168] sm:$0xff] %vm737_vm3, %v3050_v22  ;;  %784 = vst.msk [vmem:[#allocation2 + $0x170] sm:$0xff] %vm737_vm3, %v3050_v22 }
  0x2c   : > { %785 = vst.msk [vmem:[#allocation2 + $0x178] sm:$0xff] %vm737_vm3, %v3050_v22  ;;  %786 = vst.msk [vmem:[#allocation2 + $0x180] sm:$0xff] %vm737_vm3, %v3050_v22  ;;  %1368 = vmatpush1.bf16.msra.mxu1 %v2938_v52 }
  0x2d   : > { %787 = vst.msk [vmem:[#allocation2 + $0x188] sm:$0xff] %vm737_vm3, %v3050_v22  ;;  %788 = vst.msk [vmem:[#allocation2 + $0x190] sm:$0xff] %vm737_vm3, %v3050_v22  ;;  %1369 = vmatprep.subr.bf16.mxu1 %v3051_v24 }
  0x2e   : > { %1540 = vst.msk [vmem:[#allocation3] sm:$0xff] %vm737_vm3, %v3050_v22  ;;  %1541 = vst.msk [vmem:[#allocation3 + $0x8] sm:$0xff] %vm737_vm3, %v3050_v22 }
  0x2f   : > { %2631 = vmatmul.mubr.msk.bf16.gmra.mrb[8].mxu0 %vm520_vm2, %v2921_v11  ;;  %1542 = vst.msk [vmem:[#allocation3 + $0x10] sm:$0xff] %vm737_vm3, %v3050_v22  ;;  %1543 = vst.msk [vmem:[#allocation3 + $0x18] sm:$0xff] %vm737_vm3, %v3050_v22 }
  0x30   : > { %2634 = vmatprep.mubr.msk.bf16.mxu0 %vm520_vm2, %v2922_v12  ;;  %1544 = vst.msk [vmem:[#allocation3 + $0x20] sm:$0xff] %vm737_vm3, %v3050_v22  ;;  %1545 = vst.msk [vmem:[#allocation3 + $0x28] sm:$0xff] %vm737_vm3, %v3050_v22  ;;  %1370 = vmatpush1.bf16.msra.mxu1 %v2939_v0 }
  0x31   : > { %1546 = vst.msk [vmem:[#allocation3 + $0x30] sm:$0xff] %vm737_vm3, %v3050_v22  ;;  %1547 = vst.msk [vmem:[#allocation3 + $0x38] sm:$0xff] %vm737_vm3, %v3050_v22  ;;  %1371 = vmatprep.subr.bf16.mxu1 %v3051_v24 }
  0x32   : > { %1548 = vst.msk [vmem:[#allocation3 + $0x40] sm:$0xff] %vm737_vm3, %v3050_v22  ;;  %1549 = vst.msk [vmem:[#allocation3 + $0x48] sm:$0xff] %vm737_vm3, %v3050_v22 }
  0x33   : > { %1550 = vst.msk [vmem:[#allocation3 + $0x50] sm:$0xff] %vm737_vm3, %v3050_v22  ;;  %1551 = vst.msk [vmem:[#allocation3 + $0x58] sm:$0xff] %vm737_vm3, %v3050_v22 }
  0x34   : > { %1552 = vst.msk [vmem:[#allocation3 + $0x60] sm:$0xff] %vm737_vm3, %v3050_v22  ;;  %1553 = vst.msk [vmem:[#allocation3 + $0x68] sm:$0xff] %vm737_vm3, %v3050_v22  ;;  %1372 = vmatpush1.bf16.msra.mxu1 %v2940_v10 }
  0x35   : > { %1554 = vst.msk [vmem:[#allocation3 + $0x70] sm:$0xff] %vm737_vm3, %v3050_v22  ;;  %1555 = vst.msk [vmem:[#allocation3 + $0x78] sm:$0xff] %vm737_vm3, %v3050_v22 }
  0x36   : > { %1556 = vst.msk [vmem:[#allocation3 + $0x80] sm:$0xff] %vm737_vm3, %v3050_v22  ;;  %1557 = vst.msk [vmem:[#allocation3 + $0x88] sm:$0xff] %vm737_vm3, %v3050_v22 }
  0x37   : > { %2635 = vmatmul.mubr.msk.bf16.gmra.mrb[12].mxu0 %vm520_vm2, %v2923_v13  ;;  %1887 = vst.msk [vmem:[#allocation4] sm:$0xff] %vm1202_vm4, %v3050_v22  ;;  %1890 = vst.msk [vmem:[#allocation4 + $0x10] sm:$0xff] %vm1202_vm4, %v3050_v22 }
  0x38   : > { %2638 = vmatprep.mubr.msk.bf16.mxu0 %vm520_vm2, %v2924_v14  ;;  %1892 = vst.msk [vmem:[#allocation4 + $0x20] sm:$0xff] %vm1202_vm4, %v3050_v22  ;;  %1894 = vst.msk [vmem:[#allocation4 + $0x30] sm:$0xff] %vm1202_vm4, %v3050_v22 }
  0x39   : > { %1896 = vst.msk [vmem:[#allocation4 + $0x40] sm:$0xff] %vm1202_vm4, %v3050_v22 }
  0x3a   : > { %1891 = vst.msk [vmem:[#allocation4 + $0x18] sm:$0xf] %vm1888_vm10, %v3050_v22  ;;  %1893 = vst.msk [vmem:[#allocation4 + $0x28] sm:$0xf] %vm1888_vm10, %v3050_v22 }
  0x3b   : > { %1889 = vst.msk [vmem:[#allocation4 + $0x8] sm:$0xf] %vm1888_vm10, %v3050_v22  ;;  %1895 = vst.msk [vmem:[#allocation4 + $0x38] sm:$0xf] %vm1888_vm10, %v3050_v22 }
  0x3c   : > { %1897 = vst.msk [vmem:[#allocation4 + $0x48] sm:$0xf] %vm1888_vm10, %v3050_v22 }
  0x3f   : > { %2639 = vmatmul.mubr.msk.bf16.gmra.mrb[16].mxu0 %vm520_vm2, %v2925_v15 }
  0x40   : > { %2642 = vmatprep.mubr.msk.bf16.mxu0 %vm520_vm2, %v2926_v16 }
  0x47   : > { %2643 = vmatmul.mubr.msk.bf16.gmra.mrb[20].mxu0 %vm520_vm2, %v2927_v17 }
  0x48   : > { %2646 = vmatprep.mubr.msk.bf16.mxu0 %vm520_vm2, %v2928_v18 }
  0x4f   : > { %2647 = vmatmul.mubr.msk.bf16.gmra.mrb[24].mxu0 %vm520_vm2, %v2929_v19 }
  0x50   : > { %2650 = vmatprep.mubr.msk.bf16.mxu0 %vm520_vm2, %v2930_v20 }
  0x57   : > { %2651 = vmatmul.mubr.msk.bf16.gmra.mrb[28].mxu0 %vm520_vm2, %v2931_v21 }
  0xf2   : > { %v2624_v28 = vpop.f32.mrb[0].mxu0 }
  0xf3   : > { %v619_v29 = vadd.f32 %v2624_v28, %v3371_v27  ;;  %v610_v30 = vpop.f32.mrb[1].mxu0 }
  0xf4   : > { %v611_v31 = vadd.f32 %v3371_v27, %v610_v30  ;;  %v2625_v32 = vpop.f32.mrb[2].mxu0 }
  0xf5   : > { %795 = vst.msk [vmem:[#allocation2 + $0x38] sm:$0xff] %vm737_vm3, %v619_v29  ;;  %v622_v33 = vadd.f32 %v2625_v32, %v3371_v27  ;;  %v613_v34 = vpop.f32.mrb[3].mxu0 }
  0xf6   : > { %793 = vst.msk [vmem:[#allocation2 + $0x20] sm:$0xff] %vm737_vm3, %v611_v31  ;;  %v614_v36 = vadd.f32 %v3371_v27, %v613_v34 }
  0xf7   : > { %796 = vst.msk [vmem:[#allocation2 + $0x40] sm:$0xff] %vm737_vm3, %v622_v33 }
  0xf8   : > { %794 = vst.msk [vmem:[#allocation2 + $0x28] sm:$0xff] %vm737_vm3, %v614_v36 }
  0xfa   : > { %v2628_v38 = vpop.f32.mrb[4].mxu0 }
  0xfb   : > { %v635_v39 = vadd.f32 %v2628_v38, %v3371_v27  ;;  %v626_v40 = vpop.f32.mrb[5].mxu0 }
  0xfc   : > { %v627_v41 = vadd.f32 %v3371_v27, %v626_v40  ;;  %v2629_v42 = vpop.f32.mrb[6].mxu0 }
  0xfd   : > { %799 = vst.msk [vmem:[#allocation2 + $0x68] sm:$0xff] %vm737_vm3, %v635_v39  ;;  %v638_v44 = vadd.f32 %v2629_v42, %v3371_v27  ;;  %v629_v45 = vpop.f32.mrb[7].mxu0 }
  0xfe   : > { %797 = vst.msk [vmem:[#allocation2 + $0x50] sm:$0xff] %vm737_vm3, %v627_v41  ;;  %v630_v47 = vadd.f32 %v3371_v27, %v629_v45  ;;  %v844_v48 = vld [vmem:[#allocation2 + $0x38] ss:$2 sm:$0xff]  ;;  %v860_v51 = vld [vmem:[#allocation2 + $0x39] ss:$2 sm:$0xff] }
  0xff   : > { %800 = vst.msk [vmem:[#allocation2 + $0x70] sm:$0xff] %vm737_vm3, %v638_v44  ;;  %v2724_v49 = vpack.i.bf16 %v844_v48, %v842_v43  ;;  %v2729_v56 = vpack.i.bf16 %v860_v51, %v858_v50  ;;  %v955_v59 = vld [vmem:[#allocation2 + $0x39] ss:$2 sm:$0xff]  ;;  %v939_v62 = vld [vmem:[#allocation2 + $0x38] ss:$2 sm:$0xff] }
 0x100   : > { %798 = vst.msk [vmem:[#allocation2 + $0x58] sm:$0xff] %vm737_vm3, %v630_v47  ;;  %v923_v63 = vld [vmem:[#allocation2 + $0x37] ss:$2 sm:$0xff]  ;;  %v890_v30 = vld [vmem:[#allocation2 + $0x20] ss:$2 sm:$0xff] }
 0x101   : > { %2725 = vrot.lane.b32.xlu0 %v2724_v49, %s3835_s13  ;;  %v906_v12 = vld [vmem:[#allocation2 + $0x21] ss:$2 sm:$0xff] }
 0x102   : > { %v2632_v53 = vpop.f32.mrb[8].mxu0  ;;  %v874_v16 = vld [vmem:[#allocation2 + $0x1f] ss:$2 sm:$0xff] }
 0x103   : > { %v651_v54 = vadd.f32 %v2632_v53, %v3371_v27  ;;  %v642_v55 = vpop.f32.mrb[9].mxu0 }
 0x104   : > { %v643_v57 = vadd.f32 %v3371_v27, %v642_v55  ;;  %v2633_v58 = vpop.f32.mrb[10].mxu0 }
 0x105   : > { %803 = vst.msk [vmem:[#allocation2 + $0x98] sm:$0xff] %vm737_vm3, %v651_v54  ;;  %v654_v60 = vadd.f32 %v2633_v58, %v3371_v27  ;;  %2730 = vrot.lane.b32.xlu0 %v2729_v56, %s3836_s16  ;;  %v645_v61 = vpop.f32.mrb[11].mxu0 }
 0x106   : > { %801 = vst.msk [vmem:[#allocation2 + $0x80] sm:$0xff] %vm737_vm3, %v643_v57  ;;  %v646_v1 = vadd.f32 %v3371_v27, %v645_v61  ;;  %v957_v2 = vld [vmem:[#allocation2 + $0x69] ss:$2 sm:$0xff]  ;;  %v941_v3 = vld [vmem:[#allocation2 + $0x68] ss:$2 sm:$0xff] }
 0x107   : > { %v925_v4 = vld [vmem:[#allocation2 + $0x67] ss:$2 sm:$0xff]  ;;  %804 = vst.msk [vmem:[#allocation2 + $0xa0] sm:$0xff] %vm737_vm3, %v654_v60  ;;  %v1257_v5 = vpack.c.bf16 %v957_v2, %v955_v59  ;;  %v2739_v6 = vpack.i.bf16 %v941_v3, %v939_v62  ;;  %v892_v23 = vld [vmem:[#allocation2 + $0x50] ss:$2 sm:$0xff] }
 0x108   : > { %v2734_v7 = vpack.i.bf16 %v925_v4, %v923_v63  ;;  %802 = vst.msk [vmem:[#allocation2 + $0x88] sm:$0xff] %vm737_vm3, %v646_v1  ;;  %v908_v8 = vld [vmem:[#allocation2 + $0x51] ss:$2 sm:$0xff]  ;;  %v2749_v31 = vpack.i.bf16 %v892_v23, %v890_v30  ;;  %v846_v36 = vld [vmem:[#allocation2 + $0x68] ss:$2 sm:$0xff] }
 0x109   : > { %2522 = vmatprep.mubr.msk.bf16.mxu1 %vm737_vm3, %v1257_v5  ;;  %2740 = vrot.lane.b32.xlu0 %v2739_v6, %s3831_s25  ;;  %v876_v9 = vld [vmem:[#allocation2 + $0x4f] ss:$2 sm:$0xff]  ;;  %v2754_v15 = vpack.i.bf16 %v908_v8, %v906_v12 }
 0x10a   : > { %2735 = vrot.lane.b32.xlu1 %v2734_v7, %s3833_s12  ;;  %v2636_v11 = vpop.f32.mrb[12].mxu0  ;;  %v2744_v19 = vpack.i.bf16 %v876_v9, %v874_v16  ;;  %v862_v26 = vld [vmem:[#allocation2 + $0x69] ss:$2 sm:$0xff] }
 0x10b   : > { %v667_v13 = vadd.f32 %v2636_v11, %v3371_v27  ;;  %v658_v14 = vpop.f32.mrb[13].mxu0 }
 0x10c   : > { %v659_v17 = vadd.f32 %v3371_v27, %v658_v14  ;;  %v2637_v18 = vpop.f32.mrb[14].mxu0 }
 0x10d   : > { %807 = vst.msk [vmem:[#allocation2 + $0xc8] sm:$0xff] %vm737_vm3, %v667_v13  ;;  %v670_v20 = vadd.f32 %v2637_v18, %v3371_v27  ;;  %v661_v21 = vpop.f32.mrb[15].mxu0  ;;  %2755 = vrot.lane.b32.xlu0 %v2754_v15, %s3832_s14 }
 0x10e   : > { %805 = vst.msk [vmem:[#allocation2 + $0xb0] sm:$0xff] %vm737_vm3, %v659_v17  ;;  %v662_v25 = vadd.f32 %v3371_v27, %v661_v21  ;;  %2745 = vrot.lane.b32.xlu1 %v2744_v19, %s3057_s15  ;;  %v864_v28 = vld [vmem:[#allocation2 + $0x99] ss:$2 sm:$0xff]  ;;  %v848_v32 = vld [vmem:[#allocation2 + $0x98] ss:$2 sm:$0xff] }
 0x10f   : > { %808 = vst.msk [vmem:[#allocation2 + $0xd0] sm:$0xff] %vm737_vm3, %v670_v20  ;;  %v2764_v29 = vpack.i.bf16 %v864_v28, %v862_v26  ;;  %v2759_v39 = vpack.i.bf16 %v848_v32, %v846_v36  ;;  %v927_v42 = vld [vmem:[#allocation2 + $0x97] ss:$2 sm:$0xff]  ;;  %v943_v45 = vld [vmem:[#allocation2 + $0x98] ss:$2 sm:$0xff] }
 0x110   : > { %806 = vst.msk [vmem:[#allocation2 + $0xb8] sm:$0xff] %vm737_vm3, %v662_v25  ;;  %v894_v52 = vld [vmem:[#allocation2 + $0x80] ss:$2 sm:$0xff]  ;;  %v878_v56 = vld [vmem:[#allocation2 + $0x7f] ss:$2 sm:$0xff] }
 0x111   : > { %2765 = vrot.lane.b32.xlu0 %v2764_v29, %s3836_s16  ;;  %v910_v3 = vld [vmem:[#allocation2 + $0x81] ss:$2 sm:$0xff] }
 0x112   : > { %2750 = vrot.lane.b32.xlu1 %v2749_v31, %s3838_s22  ;;  %v2640_v33 = vpop.f32.mrb[16].mxu0 }
 0x113   : > { %v683_v34 = vadd.f32 %v2640_v33, %v3371_v27  ;;  %v674_v35 = vpop.f32.mrb[17].mxu0 }
 0x114   : > { %v675_v37 = vadd.f32 %v3371_v27, %v674_v35  ;;  %v2641_v38 = vpop.f32.mrb[18].mxu0 }
 0x115   : > { %811 = vst.msk [vmem:[#allocation2 + $0xf8] sm:$0xff] %vm737_vm3, %v683_v34  ;;  %v686_v40 = vadd.f32 %v2641_v38, %v3371_v27  ;;  %v677_v41 = vpop.f32.mrb[19].mxu0 }
 0x116   : > { %809 = vst.msk [vmem:[#allocation2 + $0xe0] sm:$0xff] %vm737_vm3, %v675_v37  ;;  %v678_v43 = vadd.f32 %v3371_v27, %v677_v41  ;;  %2760 = vrot.lane.b32.xlu1 %v2759_v39, %s3835_s13  ;;  %v929_v44 = vld [vmem:[#allocation2 + $0xc7] ss:$2 sm:$0xff]  ;;  %v945_v46 = vld [vmem:[#allocation2 + $0xc8] ss:$2 sm:$0xff] }
 0x117   : > { %812 = vst.msk [vmem:[#allocation2 + $0x100] sm:$0xff] %vm737_vm3, %v686_v40  ;;  %v2769_v47 = vpack.i.bf16 %v929_v44, %v927_v42  ;;  %v2774_v48 = vpack.i.bf16 %v945_v46, %v943_v45  ;;  %v896_v49 = vld [vmem:[#allocation2 + $0xb0] ss:$2 sm:$0xff]  ;;  %v880_v50 = vld [vmem:[#allocation2 + $0xaf] ss:$2 sm:$0xff] }
 0x118   : > { %810 = vst.msk [vmem:[#allocation2 + $0xe8] sm:$0xff] %vm737_vm3, %v678_v43  ;;  %v2784_v55 = vpack.i.bf16 %v896_v49, %v894_v52  ;;  %v2779_v59 = vpack.i.bf16 %v880_v50, %v878_v56  ;;  %v912_v62 = vld [vmem:[#allocation2 + $0xb1] ss:$2 sm:$0xff]  ;;  %v850_v0 = vld [vmem:[#allocation2 + $0xc8] ss:$2 sm:$0xff] }
 0x119   : > { %2770 = vrot.lane.b32.xlu0 %v2769_v47, %s3833_s12  ;;  %v2789_v4 = vpack.i.bf16 %v912_v62, %v910_v3  ;;  %v866_v9 = vld [vmem:[#allocation2 + $0xc9] ss:$2 sm:$0xff] }
 0x11a   : > { %2775 = vrot.lane.b32.xlu1 %v2774_v48, %s3831_s25  ;;  %v2644_v51 = vpop.f32.mrb[20].mxu0 }
 0x11b   : > { %v699_v53 = vadd.f32 %v2644_v51, %v3371_v27  ;;  %v690_v54 = vpop.f32.mrb[21].mxu0 }
 0x11c   : > { %v691_v57 = vadd.f32 %v3371_v27, %v690_v54  ;;  %v2645_v58 = vpop.f32.mrb[22].mxu0 }
 0x11d   : > { %815 = vst.msk [vmem:[#allocation2 + $0x128] sm:$0xff] %vm737_vm3, %v699_v53  ;;  %v702_v60 = vadd.f32 %v2645_v58, %v3371_v27  ;;  %v693_v61 = vpop.f32.mrb[23].mxu0  ;;  %2785 = vrot.lane.b32.xlu0 %v2784_v55, %s3838_s22 }
 0x11e   : > { %813 = vst.msk [vmem:[#allocation2 + $0x110] sm:$0xff] %vm737_vm3, %v691_v57  ;;  %v694_v63 = vadd.f32 %v3371_v27, %v693_v61  ;;  %2780 = vrot.lane.b32.xlu1 %v2779_v59, %s3057_s15  ;;  %v852_v1 = vld [vmem:[#allocation2 + $0xf8] ss:$2 sm:$0xff]  ;;  %v868_v5 = vld [vmem:[#allocation2 + $0xf9] ss:$2 sm:$0xff] }
 0x11f   : > { %816 = vst.msk [vmem:[#allocation2 + $0x130] sm:$0xff] %vm737_vm3, %v702_v60  ;;  %v2794_v2 = vpack.i.bf16 %v852_v1, %v850_v0  ;;  %v2799_v12 = vpack.i.bf16 %v868_v5, %v866_v9  ;;  %v947_v15 = vld [vmem:[#allocation2 + $0xf8] ss:$2 sm:$0xff]  ;;  %v931_v18 = vld [vmem:[#allocation2 + $0xf7] ss:$2 sm:$0xff] }
 0x120   : > { %814 = vst.msk [vmem:[#allocation2 + $0x118] sm:$0xff] %vm737_vm3, %v694_v63  ;;  %v882_v28 = vld [vmem:[#allocation2 + $0xdf] ss:$2 sm:$0xff]  ;;  %v898_v32 = vld [vmem:[#allocation2 + $0xe0] ss:$2 sm:$0xff] }
 0x121   : > { %2795 = vrot.lane.b32.xlu0 %v2794_v2, %s3835_s13  ;;  %v914_v40 = vld [vmem:[#allocation2 + $0xe1] ss:$2 sm:$0xff] }
 0x122   : > { %2790 = vrot.lane.b32.xlu1 %v2789_v4, %s3832_s14  ;;  %v2648_v6 = vpop.f32.mrb[24].mxu0  ;;  %v826_v5 = vld [vmem:[#allocation2 + $0x7] ss:$2 sm:$0xff] }
 0x123   : > { %v715_v7 = vadd.f32 %v2648_v6, %v3371_v27  ;;  %v706_v8 = vpop.f32.mrb[25].mxu0 }
 0x124   : > { %v707_v10 = vadd.f32 %v3371_v27, %v706_v8  ;;  %v2649_v11 = vpop.f32.mrb[26].mxu0 }
 0x125   : > { %819 = vst.msk [vmem:[#allocation2 + $0x158] sm:$0xff] %vm737_vm3, %v715_v7  ;;  %v718_v13 = vadd.f32 %v2649_v11, %v3371_v27  ;;  %v709_v14 = vpop.f32.mrb[27].mxu0  ;;  %v828_v11 = vld [vmem:[#allocation2 + $0x37] ss:$2 sm:$0xff] }
 0x126   : > { %817 = vst.msk [vmem:[#allocation2 + $0x140] sm:$0xff] %vm737_vm3, %v707_v10  ;;  %v710_v16 = vadd.f32 %v3371_v27, %v709_v14  ;;  %2800 = vrot.lane.b32.xlu1 %v2799_v12, %s3836_s16  ;;  %v949_v17 = vld [vmem:[#allocation2 + $0x128] ss:$2 sm:$0xff]  ;;  %v933_v19 = vld [vmem:[#allocation2 + $0x127] ss:$2 sm:$0xff] }
 0x127   : > { %820 = vst.msk [vmem:[#allocation2 + $0x160] sm:$0xff] %vm737_vm3, %v718_v13  ;;  %v2809_v20 = vpack.i.bf16 %v949_v17, %v947_v15  ;;  %v2804_v21 = vpack.i.bf16 %v933_v19, %v931_v18  ;;  %v884_v23 = vld [vmem:[#allocation2 + $0x10f] ss:$2 sm:$0xff]  ;;  %v900_v25 = vld [vmem:[#allocation2 + $0x110] ss:$2 sm:$0xff] }
 0x128   : > { %818 = vst.msk [vmem:[#allocation2 + $0x148] sm:$0xff] %vm737_vm3, %v710_v16  ;;  %v2814_v31 = vpack.i.bf16 %v884_v23, %v882_v28  ;;  %v2819_v35 = vpack.i.bf16 %v900_v25, %v898_v32  ;;  %v916_v36 = vld [vmem:[#allocation2 + $0x111] ss:$2 sm:$0xff]  ;;  %v854_v41 = vld [vmem:[#allocation2 + $0x128] ss:$2 sm:$0xff] }
 0x129   : > { %2810 = vrot.lane.b32.xlu0 %v2809_v20, %s3831_s25  ;;  %v2824_v43 = vpack.i.bf16 %v916_v36, %v914_v40  ;;  %v870_v46 = vld [vmem:[#allocation2 + $0x129] ss:$2 sm:$0xff] }
 0x12a   : > { %2805 = vrot.lane.b32.xlu1 %v2804_v21, %s3833_s12  ;;  %v2652_v26 = vpop.f32.mrb[28].mxu0 }
 0x12b   : > { %v731_v29 = vadd.f32 %v2652_v26, %v3371_v27  ;;  %v722_v30 = vpop.f32.mrb[29].mxu0 }
 0x12c   : > { %v723_v33 = vadd.f32 %v3371_v27, %v722_v30  ;;  %v2653_v34 = vpop.f32.mrb[30].mxu0 }
 0x12d   : > { %823 = vst.msk [vmem:[#allocation2 + $0x188] sm:$0xff] %vm737_vm3, %v731_v29  ;;  %v734_v37 = vadd.f32 %v2653_v34, %v3371_v27  ;;  %v725_v38 = vpop.f32.mrb[31].mxu0  ;;  %2815 = vrot.lane.b32.xlu0 %v2814_v31, %s3057_s15 }
 0x12e   : > { %821 = vst.msk [vmem:[#allocation2 + $0x170] sm:$0xff] %vm737_vm3, %v723_v33  ;;  %v726_v39 = vadd.f32 %v3371_v27, %v725_v38  ;;  %2820 = vrot.lane.b32.xlu1 %v2819_v35, %s3838_s22  ;;  %v856_v42 = vld [vmem:[#allocation2 + $0x158] ss:$2 sm:$0xff]  ;;  %v872_v45 = vld [vmem:[#allocation2 + $0x159] ss:$2 sm:$0xff] }
 0x12f   : > { %824 = vst.msk [vmem:[#allocation2 + $0x190] sm:$0xff] %vm737_vm3, %v734_v37  ;;  %v2829_v44 = vpack.i.bf16 %v856_v42, %v854_v41  ;;  %v2834_v47 = vpack.i.bf16 %v872_v45, %v870_v46  ;;  %v902_v27 = vld [vmem:[#allocation2 + $0x140] ss:$2 sm:$0xff]  ;;  %v886_v49 = vld [vmem:[#allocation2 + $0x13f] ss:$2 sm:$0xff] }
 0x130   : > { %822 = vst.msk [vmem:[#allocation2 + $0x178] sm:$0xff] %vm737_vm3, %v726_v39  ;;  %v935_v55 = vld [vmem:[#allocation2 + $0x157] ss:$2 sm:$0xff]  ;;  %v951_v60 = vld [vmem:[#allocation2 + $0x158] ss:$2 sm:$0xff] }
 0x131   : > { %2825 = vrot.lane.b32.xlu0 %v2824_v43, %s3832_s14  ;;  %v918_v56 = vld [vmem:[#allocation2 + $0x141] ss:$2 sm:$0xff] }
 0x132   : > { %2830 = vrot.lane.b32.xlu1 %v2829_v44, %s3835_s13  ;;  %v961_v38 = vld [vmem:[#allocation2 + $0xc9] ss:$2 sm:$0xff]  ;;  %v959_v45 = vld [vmem:[#allocation2 + $0x99] ss:$2 sm:$0xff]  ;;  %s3847_s13 = smov 96  }
 0x135   : > { %2835 = vrot.lane.b32.xlu0 %v2834_v47, %s3836_s16  ;;  %v1259_v47 = vpack.c.bf16 %v961_v38, %v959_v45  ;;  %s3848_s16 = smov 80  }
 0x136   : > { %v937_v53 = vld [vmem:[#allocation2 + $0x187] ss:$2 sm:$0xff]  ;;  %v953_v59 = vld [vmem:[#allocation2 + $0x188] ss:$2 sm:$0xff] }
 0x137   : > { %v904_v48 = vld [vmem:[#allocation2 + $0x170] ss:$2 sm:$0xff]  ;;  %v888_v50 = vld [vmem:[#allocation2 + $0x16f] ss:$2 sm:$0xff]  ;;  %v2849_v57 = vpack.i.bf16 %v937_v53, %v935_v55  ;;  %v2859_v61 = vpack.i.bf16 %v953_v59, %v951_v60 }
 0x138   : > { %v2844_v51 = vpack.i.bf16 %v904_v48, %v902_v27  ;;  %v2839_v52 = vpack.i.bf16 %v888_v50, %v886_v49  ;;  %v920_v54 = vld [vmem:[#allocation2 + $0x171] ss:$2 sm:$0xff] }
 0x139   : > { %v2854_v58 = vpack.i.bf16 %v920_v54, %v918_v56  ;;  %v830_v27 = vld [vmem:[#allocation2 + $0x67] ss:$2 sm:$0xff]  ;;  %v832_v48 = vld [vmem:[#allocation2 + $0x97] ss:$2 sm:$0xff] }
 0x13a   : > { %2845 = vrot.lane.b32.xlu0 %v2844_v51, %s3838_s22  ;;  %2840 = vrot.lane.b32.xlu1 %v2839_v52, %s3057_s15 }
 0x13e   : > { %2850 = vrot.lane.b32.xlu0 %v2849_v57, %s3833_s12  ;;  %2855 = vrot.lane.b32.xlu1 %v2854_v58, %s3832_s14  ;;  %s3846_s14 = smov 16  }
 0x142   : > { %2860 = vrot.lane.b32.xlu1 %v2859_v61, %s3831_s25  ;;  %s3850_s25 = smov 64  }
 0x173   : > { %v2726_v62 = vpop.permute.xlu0 %2725 }
 0x174   : > { %v2728_v2 = vunpack.i.h.bf16 %v2726_v62  ;;  %v2727_v3 = vunpack.i.l.bf16 %v2726_v62 }
 0x176   : > { %v1194_v12 = vsel %vm737_vm3, %v826_v5, %v2727_v3  ;;  %v1195_v13 = vsel %vm737_vm3, %v828_v11, %v2728_v2 }
 0x177   : > { %v2731_v63 = vpop.permute.xlu0 %2730 }
 0x178   : > { %v2733_v6 = vunpack.i.h.bf16 %v2731_v63  ;;  %v2732_v7 = vunpack.i.l.bf16 %v2731_v63 }
 0x17a   : > { %v1203_v15 = vsel %vm1202_vm4, %v1194_v12, %v2732_v7  ;;  %v1204_v16 = vsel %vm1202_vm4, %v1195_v13, %v2733_v6 }
 0x17b   : > { %v2741_v0 = vpop.permute.xlu0 %2740 }
 0x17c   : > { %v2736_v1 = vpop.permute.xlu1 %2735  ;;  %v2743_v31 = vunpack.i.h.bf16 %v2741_v0  ;;  %v2742_v32 = vunpack.i.l.bf16 %v2741_v0 }
 0x17d   : > { %v2738_v25 = vunpack.i.h.bf16 %v2736_v1  ;;  %v2737_v26 = vunpack.i.l.bf16 %v2736_v1 }
 0x17f   : > { %v2756_v8 = vpop.permute.xlu0 %2755 }
 0x180   : > { %v2746_v4 = vpop.permute.xlu1 %2745  ;;  %v2758_v19 = vunpack.i.h.bf16 %v2756_v8  ;;  %v2757_v20 = vunpack.i.l.bf16 %v2756_v8 }
 0x181   : > { %v2748_v9 = vunpack.i.h.bf16 %v2746_v4  ;;  %v2747_v10 = vunpack.i.l.bf16 %v2746_v4 }
 0x183   : > { %v1213_v21 = vsel %vm1211_vm5, %v1204_v16, %v2748_v9  ;;  %v1212_v23 = vsel %vm1211_vm5, %v1203_v15, %v2747_v10  ;;  %v2766_v28 = vpop.permute.xlu0 %2765 }
 0x184   : > { %v2751_v14 = vpop.permute.xlu1 %2750  ;;  %v2768_v52 = vunpack.i.h.bf16 %v2766_v28  ;;  %v2767_v53 = vunpack.i.l.bf16 %v2766_v28 }
 0x185   : > { %v2753_v17 = vunpack.i.h.bf16 %v2751_v14  ;;  %v2752_v18 = vunpack.i.l.bf16 %v2751_v14  ;;  %v965_v14 = vld [vmem:[#allocation2 + $0x129] ss:$2 sm:$0xff] }
 0x187   : > { %v1221_v29 = vsel %vm1220_vm6, %v1212_v23, %v2752_v18  ;;  %v1222_v30 = vsel %vm1220_vm6, %v1213_v21, %v2753_v17  ;;  %v963_v18 = vld [vmem:[#allocation2 + $0xf9] ss:$2 sm:$0xff] }
 0x188   : > { %v1230_v33 = vsel %vm1229_vm7, %v1221_v29, %v2757_v20  ;;  %v1231_v34 = vsel %vm1229_vm7, %v1222_v30, %v2758_v19  ;;  %v2761_v35 = vpop.permute.xlu1 %2760  ;;  %v1261_v20 = vpack.c.bf16 %v965_v14, %v963_v18  ;;  %v834_v29 = vld [vmem:[#allocation2 + $0xc7] ss:$2 sm:$0xff]  ;;  %v836_v30 = vld [vmem:[#allocation2 + $0xf7] ss:$2 sm:$0xff] }
 0x189   : > { %v1239_v36 = vsel %vm1238_vm8, %v1230_v33, %v2737_v26  ;;  %v1240_v37 = vsel %vm1238_vm8, %v1231_v34, %v2738_v25  ;;  %v2763_v41 = vunpack.i.h.bf16 %v2761_v35  ;;  %v2762_v42 = vunpack.i.l.bf16 %v2761_v35 }
 0x18a   : > { %v1248_v39 = vsel %vm1247_vm9, %v1239_v36, %v2742_v32  ;;  %v1249_v40 = vsel %vm1247_vm9, %v1240_v37, %v2743_v31 }
 0x18b   : > { %v2771_v43 = vpop.permute.xlu0 %2770  ;;  %v1256_v44 = vpack.c.bf16 %v1249_v40, %v1248_v39  ;;  %v1197_v49 = vsel %vm737_vm3, %v832_v48, %v2763_v41  ;;  %v1196_v50 = vsel %vm737_vm3, %v830_v27, %v2762_v42 }
 0x18c   : > { %v2776_v46 = vpop.permute.xlu1 %2775  ;;  %v1205_v59 = vsel %vm1202_vm4, %v1196_v50, %v2767_v53  ;;  %v1206_v60 = vsel %vm1202_vm4, %v1197_v49, %v2768_v52  ;;  %v2773_v2 = vunpack.i.h.bf16 %v2771_v43  ;;  %v2772_v3 = vunpack.i.l.bf16 %v2771_v43 }
 0x18d   : > { %1388 = vmatmul.mubr.bf16.vlgmr.msra.gmra.mrb[0].mxu1 %v1256_v44  ;;  %v2778_v6 = vunpack.i.h.bf16 %v2776_v46  ;;  %v2777_v7 = vunpack.i.l.bf16 %v2776_v46 }
 0x18e   : > { %2523 = vmatprep.mubr.msk.bf16.mxu1 %vm737_vm3, %v1259_v47 }
 0x18f   : > { %v2786_v51 = vpop.permute.xlu0 %2785 }
 0x190   : > { %v2781_v54 = vpop.permute.xlu1 %2780  ;;  %v2788_v57 = vunpack.i.h.bf16 %v2786_v51  ;;  %v2787_v58 = vunpack.i.l.bf16 %v2786_v51 }
 0x191   : > { %v2783_v55 = vunpack.i.h.bf16 %v2781_v54  ;;  %v2782_v56 = vunpack.i.l.bf16 %v2781_v54 }
 0x193   : > { %v1214_v61 = vsel %vm1211_vm5, %v1205_v59, %v2782_v56  ;;  %v1215_v62 = vsel %vm1211_vm5, %v1206_v60, %v2783_v55  ;;  %v2796_v8 = vpop.permute.xlu0 %2795 }
 0x194   : > { %v2791_v63 = vpop.permute.xlu1 %2790  ;;  %v1223_v4 = vsel %vm1220_vm6, %v1214_v61, %v2787_v58  ;;  %v1224_v5 = vsel %vm1220_vm6, %v1215_v62, %v2788_v57  ;;  %v2798_v21 = vunpack.i.h.bf16 %v2796_v8  ;;  %v2797_v23 = vunpack.i.l.bf16 %v2796_v8  ;;  %v969_v57 = vld [vmem:[#allocation2 + $0x189] ss:$2 sm:$0xff] }
 0x195   : > { %v2793_v0 = vunpack.i.h.bf16 %v2791_v63  ;;  %v2792_v1 = vunpack.i.l.bf16 %v2791_v63  ;;  %v967_v63 = vld [vmem:[#allocation2 + $0x159] ss:$2 sm:$0xff] }
 0x196   : > { %v1199_v32 = vsel %vm737_vm3, %v836_v30, %v2798_v21  ;;  %v1198_v33 = vsel %vm737_vm3, %v834_v29, %v2797_v23 }
 0x197   : > { %v1232_v9 = vsel %vm1229_vm7, %v1223_v4, %v2792_v1  ;;  %v1233_v10 = vsel %vm1229_vm7, %v1224_v5, %v2793_v0  ;;  %v840_v4 = vld [vmem:[#allocation2 + $0x157] ss:$2 sm:$0xff] }
 0x198   : > { %v2801_v11 = vpop.permute.xlu1 %2800  ;;  %v1241_v12 = vsel %vm1238_vm8, %v1232_v9, %v2772_v3  ;;  %v1242_v13 = vsel %vm1238_vm8, %v1233_v10, %v2773_v2  ;;  %v1263_v2 = vpack.c.bf16 %v969_v57, %v967_v63  ;;  %v838_v3 = vld [vmem:[#allocation2 + $0x127] ss:$2 sm:$0xff] }
 0x199   : > { %v1250_v15 = vsel %vm1247_vm9, %v1241_v12, %v2777_v7  ;;  %v1251_v16 = vsel %vm1247_vm9, %v1242_v13, %v2778_v6  ;;  %v2803_v26 = vunpack.i.h.bf16 %v2801_v11  ;;  %v2802_v28 = vunpack.i.l.bf16 %v2801_v11 }
 0x19a   : > { %v1258_v17 = vpack.c.bf16 %v1251_v16, %v1250_v15 }
 0x19b   : > { %v2811_v19 = vpop.permute.xlu0 %2810  ;;  %v1208_v37 = vsel %vm1202_vm4, %v1199_v32, %v2803_v26  ;;  %v1207_v38 = vsel %vm1202_vm4, %v1198_v33, %v2802_v28 }
 0x19c   : > { %v2806_v25 = vpop.permute.xlu1 %2805  ;;  %1396 = vmatmul.mubr.bf16.gmra.mrb[4].mxu1 %v1258_v17  ;;  %v2813_v49 = vunpack.i.h.bf16 %v2811_v19  ;;  %v2812_v50 = vunpack.i.l.bf16 %v2811_v19 }
 0x19d   : > { %2524 = vmatprep.mubr.msk.bf16.mxu1 %vm737_vm3, %v1261_v20  ;;  %v2808_v46 = vunpack.i.h.bf16 %v2806_v25  ;;  %v2807_v47 = vunpack.i.l.bf16 %v2806_v25 }
 0x19f   : > { %v2816_v31 = vpop.permute.xlu0 %2815 }
 0x1a0   : > { %v2818_v34 = vunpack.i.h.bf16 %v2816_v31  ;;  %v2817_v35 = vunpack.i.l.bf16 %v2816_v31  ;;  %v2821_v36 = vpop.permute.xlu1 %2820 }
 0x1a1   : > { %v2823_v39 = vunpack.i.h.bf16 %v2821_v36  ;;  %v2822_v40 = vunpack.i.l.bf16 %v2821_v36 }
 0x1a2   : > { %v1216_v41 = vsel %vm1211_vm5, %v1207_v38, %v2817_v35  ;;  %v1217_v42 = vsel %vm1211_vm5, %v1208_v37, %v2818_v34  ;;  %v2941_v38 = vld [vmem:[%s3824_s5] sm:$0xff]  }
 0x1a3   : > { %v2826_v43 = vpop.permute.xlu0 %2825  ;;  %v1225_v27 = vsel %vm1220_vm6, %v1216_v41, %v2822_v40  ;;  %v1226_v48 = vsel %vm1220_vm6, %v1217_v42, %v2823_v39  ;;  %2654 = vmatprep.subr.bf16.mxu1 %v2941_v38  ;;  %v2512_v39 = vld [vmem:[%s3823_s4] ss:$0 sm:$0xff] }
 0x1a4   : > { %v2828_v44 = vunpack.i.h.bf16 %v2826_v43  ;;  %v2827_v45 = vunpack.i.l.bf16 %v2826_v43  ;;  %v2831_v53 = vpop.permute.xlu1 %2830  ;;  %2655 = vmatpush3.bf16.msra.mxu1 %v2941_v38 }
 0x1a5   : > { %v2833_v60 = vunpack.i.h.bf16 %v2831_v53  ;;  %v2832_v61 = vunpack.i.l.bf16 %v2831_v53 }
 0x1a6   : > { %v1234_v51 = vsel %vm1229_vm7, %v1225_v27, %v2827_v45  ;;  %v1235_v52 = vsel %vm1229_vm7, %v1226_v48, %v2828_v44 }
 0x1a7   : > { %v2836_v54 = vpop.permute.xlu0 %2835  ;;  %v1243_v55 = vsel %vm1238_vm8, %v1234_v51, %v2807_v47  ;;  %v1244_v56 = vsel %vm1238_vm8, %v1235_v52, %v2808_v46  ;;  %v1201_v7 = vsel %vm737_vm3, %v840_v4, %v2833_v60  ;;  %v1200_v8 = vsel %vm737_vm3, %v838_v3, %v2832_v61 }
 0x1a8   : > { %v1252_v58 = vsel %vm1247_vm9, %v1243_v55, %v2812_v50  ;;  %v1253_v59 = vsel %vm1247_vm9, %v1244_v56, %v2813_v49  ;;  %v2838_v0 = vunpack.i.h.bf16 %v2836_v54  ;;  %v2837_v1 = vunpack.i.l.bf16 %v2836_v54 }
 0x1a9   : > { %v1260_v62 = vpack.c.bf16 %v1253_v59, %v1252_v58 }
 0x1aa   : > { %v1209_v11 = vsel %vm1202_vm4, %v1200_v8, %v2837_v1  ;;  %v1210_v12 = vsel %vm1202_vm4, %v1201_v7, %v2838_v0 }
 0x1ab   : > { %1404 = vmatmul.mubr.bf16.gmra.mrb[8].mxu1 %v1260_v62 }
 0x1ac   : > { %v2846_v5 = vpop.permute.xlu0 %2845  ;;  %v2841_v6 = vpop.permute.xlu1 %2840  ;;  %2525 = vmatprep.mubr.msk.bf16.mxu1 %vm737_vm3, %v1263_v2 }
 0x1ad   : > { %v2843_v9 = vunpack.i.h.bf16 %v2841_v6  ;;  %v2842_v10 = vunpack.i.l.bf16 %v2841_v6  ;;  %v2848_v13 = vunpack.i.h.bf16 %v2846_v5  ;;  %v2847_v14 = vunpack.i.l.bf16 %v2846_v5 }
 0x1af   : > { %v1218_v15 = vsel %vm1211_vm5, %v1209_v11, %v2842_v10  ;;  %v1219_v16 = vsel %vm1211_vm5, %v1210_v12, %v2843_v9  ;;  %v2942_v11 = vld [vmem:[%s3826_s7] sm:$0xff]   ;;  %v2943_v12 = vld [vmem:[%s3826_s7 + $0x8] sm:$0xff]  }
 0x1b0   : > { %v2851_v17 = vpop.permute.xlu0 %2850  ;;  %v2856_v18 = vpop.permute.xlu1 %2855  ;;  %v1227_v25 = vsel %vm1220_vm6, %v1218_v15, %v2847_v14  ;;  %v1228_v26 = vsel %vm1220_vm6, %v1219_v16, %v2848_v13  ;;  %1841 = vmatpush1.bf16.msra.mxu0 %v2942_v11  ;;  %v2944_v13 = vld [vmem:[%s3826_s7 + $0x10] sm:$0xff]   ;;  %v2945_v14 = vld [vmem:[%s3826_s7 + $0x18] sm:$0xff]   ;;  %v2946_v15 = vld [vmem:[%s3826_s7 + $0x20] sm:$0xff]  }
 0x1b1   : > { %v2858_v19 = vunpack.i.h.bf16 %v2856_v18  ;;  %v2857_v20 = vunpack.i.l.bf16 %v2856_v18  ;;  %v2853_v21 = vunpack.i.h.bf16 %v2851_v17  ;;  %v2852_v23 = vunpack.i.l.bf16 %v2851_v17  ;;  %1842 = vmatprep.subr.bf16.mxu0 %v3051_v24  ;;  %v2947_v16 = vld [vmem:[%s3826_s7 + $0x28] sm:$0xff]   ;;  %v2948_v17 = vld [vmem:[%s3826_s7 + $0x30] sm:$0xff]   ;;  %v2526_v18 = vld [vmem:[%s3825_s6] ss:$0 sm:$0xff] }
 0x1b3   : > { %v1236_v28 = vsel %vm1229_vm7, %v1227_v25, %v2857_v20  ;;  %v1237_v29 = vsel %vm1229_vm7, %v1228_v26, %v2858_v19 }
 0x1b4   : > { %v2861_v30 = vpop.permute.xlu1 %2860  ;;  %v1245_v33 = vsel %vm1238_vm8, %v1236_v28, %v2852_v23  ;;  %v1246_v34 = vsel %vm1238_vm8, %v1237_v29, %v2853_v21  ;;  %1843 = vmatpush1.bf16.msra.mxu0 %v2943_v12 }
 0x1b5   : > { %v2863_v31 = vunpack.i.h.bf16 %v2861_v30  ;;  %v2862_v32 = vunpack.i.l.bf16 %v2861_v30  ;;  %1844 = vmatprep.subr.bf16.mxu0 %v3051_v24 }
 0x1b7   : > { %v1254_v35 = vsel %vm1247_vm9, %v1245_v33, %v2862_v32  ;;  %v1255_v36 = vsel %vm1247_vm9, %v1246_v34, %v2863_v31 }
 0x1b8   : > { %v1262_v37 = vpack.c.bf16 %v1255_v36, %v1254_v35  ;;  %1845 = vmatpush1.bf16.msra.mxu0 %v2944_v13 }
 0x1b9   : > { %1846 = vmatprep.subr.bf16.mxu0 %v3051_v24 }
 0x1ba   : > { %1412 = vmatmul.mubr.bf16.gmra.mrb[12].mxu1 %v1262_v37 }
 0x1bc   : > { %1847 = vmatpush1.bf16.msra.mxu0 %v2945_v14 }
 0x1bd   : > { %1848 = vmatprep.subr.bf16.mxu0 %v3051_v24 }
 0x1c0   : > { %1849 = vmatpush1.bf16.msra.mxu0 %v2946_v15 }
 0x1c1   : > { %1850 = vmatprep.subr.bf16.mxu0 %v3051_v24 }
 0x1c4   : > { %1851 = vmatpush1.bf16.msra.mxu0 %v2947_v16 }
 0x1c5   : > { %1852 = vmatprep.subr.bf16.mxu0 %v3051_v24 }
 0x1c8   : > { %1853 = vmatpush1.bf16.msra.mxu0 %v2948_v17 }
 0x1c9   : > { %1854 = vmatprep.subr.bf16.mxu0 %v3051_v24 }
 0x260   : > { %v1389_v40 = vpop.f32.mrb[0].mxu1 }
 0x261   : > { %v3564_v41 = vadd.f32 %v2512_v39, %v1389_v40  ;;  %v1391_v42 = vpop.f32.mrb[1].mxu1 }
 0x262   : > { %v1392_v43 = vpop.f32.mrb[2].mxu1 }
 0x263   : > { %v3566_v44 = vadd.f32 %v2512_v39, %v1392_v43  ;;  %v1394_v45 = vpop.f32.mrb[3].mxu1  ;;  %v1420_v46 = vand.u32 2147483647, %v3564_v41 }
 0x265   : > { %v1421_v47 = vand.u32 2147483647, %v3566_v44 }
 0x267   : > { %v1428_v27 = vpack.c.bf16 %v1421_v47, %v1420_v46 }
 0x269   : > { %2656 = vmatprep.mubr.msk.bf16.mxu1 %vm737_vm3, %v1428_v27 }
 0x26f   : > { %v1397_v48 = vpop.f32.mrb[4].mxu1 }
 0x270   : > { %v3571_v49 = vadd.f32 %v2512_v39, %v1397_v48  ;;  %v1399_v50 = vpop.f32.mrb[5].mxu1 }
 0x271   : > { %v1400_v51 = vpop.f32.mrb[6].mxu1 }
 0x272   : > { %v3573_v52 = vadd.f32 %v2512_v39, %v1400_v51  ;;  %v1402_v53 = vpop.f32.mrb[7].mxu1  ;;  %v1422_v54 = vand.u32 2147483647, %v3571_v49 }
 0x274   : > { %v1423_v55 = vand.u32 2147483647, %v3573_v52 }
 0x276   : > { %v1429_v56 = vpack.c.bf16 %v1423_v55, %v1422_v54 }
 0x278   : > { %2657 = vmatmul.mubr.msk.bf16.vlgmr.msra.gmra.mrb[16].mxu1 %vm737_vm3, %v1429_v56 }
 0x27e   : > { %v1405_v57 = vpop.f32.mrb[8].mxu1 }
 0x27f   : > { %v3578_v58 = vadd.f32 %v2512_v39, %v1405_v57  ;;  %v1407_v59 = vpop.f32.mrb[9].mxu1 }
 0x280   : > { %v1408_v60 = vpop.f32.mrb[10].mxu1 }
 0x281   : > { %v3580_v61 = vadd.f32 %v2512_v39, %v1408_v60  ;;  %v1410_v62 = vpop.f32.mrb[11].mxu1  ;;  %v1424_v63 = vand.u32 2147483647, %v3578_v58 }
 0x283   : > { %v1425_v0 = vand.u32 2147483647, %v3580_v61 }
 0x285   : > { %v1430_v1 = vpack.c.bf16 %v1425_v0, %v1424_v63 }
 0x287   : > { %2660 = vmatprep.mubr.msk.bf16.mxu1 %vm737_vm3, %v1430_v1  ;;  %v1586_v1 = vld [vmem:[#allocation3 + $0x9] ss:$2 sm:$0xf] }
 0x28d   : > { %v1413_v2 = vpop.f32.mrb[12].mxu1 }
 0x28e   : > { %v3585_v3 = vadd.f32 %v2512_v39, %v1413_v2  ;;  %v1415_v4 = vpop.f32.mrb[13].mxu1 }
 0x28f   : > { %v1416_v5 = vpop.f32.mrb[14].mxu1 }
 0x290   : > { %v3587_v6 = vadd.f32 %v2512_v39, %v1416_v5  ;;  %v1418_v7 = vpop.f32.mrb[15].mxu1  ;;  %v1426_v8 = vand.u32 2147483647, %v3585_v3 }
 0x292   : > { %v1427_v9 = vand.u32 2147483647, %v3587_v6 }
 0x294   : > { %v1431_v10 = vpack.c.bf16 %v1427_v9, %v1426_v8 }
 0x296   : > { %2661 = vmatmul.mubr.msk.bf16.gmra.mrb[20].mxu1 %vm737_vm3, %v1431_v10 }
 0x34b   : > { %v2658_v19 = vpop.f32.mrb[16].mxu1 }
 0x34c   : > { %v1502_v20 = vadd.f32 %v2658_v19, %v2526_v18  ;;  %v1493_v21 = vpop.f32.mrb[17].mxu1 }
 0x34d   : > { %v1494_v23 = vadd.f32 %v2526_v18, %v1493_v21  ;;  %v2659_v25 = vpop.f32.mrb[18].mxu1 }
 0x34e   : > { %2969 = vrcp.f32 %v1502_v20  ;;  %v1505_v26 = vadd.f32 %v2659_v25, %v2526_v18  ;;  %v1496_v28 = vpop.f32.mrb[19].mxu1 }
 0x34f   : > { %2971 = vrcp.f32 %v1494_v23  ;;  %v1497_v29 = vadd.f32 %v2526_v18, %v1496_v28 }
 0x350   : > { %2973 = vrcp.f32 %v1505_v26 }
 0x351   : > { %2975 = vrcp.f32 %v1497_v29 }
 0x358   : > { %v2970_v30 = vpop.eup %2969 }
 0x359   : > { %v2972_v31 = vpop.eup %2971  ;;  %v1534_v32 = vmul.f32 %v2970_v30, %v3571_v49 }
 0x35a   : > { %v2974_v33 = vpop.eup %2973  ;;  %v1532_v34 = vmul.f32 %v2972_v31, %v3564_v41 }
 0x35b   : > { %v2976_v35 = vpop.eup %2975  ;;  %1563 = vst.msk [vmem:[#allocation3 + $0x38] sm:$0xff] %vm737_vm3, %v1534_v32  ;;  %v1535_v36 = vmul.f32 %v2974_v33, %v3573_v52  ;;  %v2949_v52 = vld [vmem:[%s3826_s7 + $0x38] sm:$0xff]   ;;  %v2950_v33 = vld [vmem:[%s3826_s7 + $0x40] sm:$0xff]  }
 0x35c   : > { %1561 = vst.msk [vmem:[#allocation3 + $0x18] sm:$0xff] %vm737_vm3, %v1532_v34  ;;  %v1533_v37 = vmul.f32 %v2976_v35, %v3566_v44  ;;  %1855 = vmatpush1.bf16.msra.mxu0 %v2949_v52 }
 0x35d   : > { %1564 = vst.msk [vmem:[#allocation3 + $0x48] sm:$0xff] %vm737_vm3, %v1535_v36  ;;  %1856 = vmatprep.subr.bf16.mxu0 %v3051_v24 }
 0x35e   : > { %1562 = vst.msk [vmem:[#allocation3 + $0x28] sm:$0xff] %vm737_vm3, %v1533_v37 }
 0x360   : > { %1857 = vmatpush1.bf16.msra.mxu0 %v2950_v33  ;;  %v2956_v33 = vld [vmem:[%s3828_s9 + $0x8] sm:$0xff]  }
 0x361   : > { %2664 = vmatprep.subr.bf16.mxu0 %v3050_v22 }
 0x362   : > { %v1604_v54 = vld [vmem:[#allocation3 + $0x38] ss:$2 sm:$0xf]  ;;  %v1596_v55 = vld [vmem:[#allocation3 + $0x37] ss:$2 sm:$0xf] }
 0x363   : > { %v1602_v56 = vld [vmem:[#allocation3 + $0x18] ss:$2 sm:$0xf]  ;;  %v1594_v57 = vld [vmem:[#allocation3 + $0x17] ss:$2 sm:$0xf] }
 0x364   : > { %v1637_v59 = vld [vmem:[#allocation3 + $0x49] ss:$2 sm:$0xf]  ;;  %v1690_v5 = vcombine.low %v1602_v56, %v1604_v54  ;;  %v1678_v7 = vcombine.low %v1594_v57, %v1596_v55  ;;  %v1582_v9 = vld [vmem:[#allocation3 + $0x48] ss:$2 sm:$0xf] }
 0x365   : > { %v1588_v2 = vld [vmem:[#allocation3 + $0x29] ss:$2 sm:$0xf]  ;;  %v1580_v4 = vld [vmem:[#allocation3 + $0x28] ss:$2 sm:$0xf] }
 0x366   : > { %v1619_v21 = vld [vmem:[#allocation3 + $0x27] ss:$2 sm:$0xf]  ;;  %v1666_v28 = vcombine.low %v1586_v1, %v1588_v2  ;;  %v1610_v31 = vld [vmem:[#allocation3 + $0x19] ss:$2 sm:$0xf] }
 0x367   : > { %v1621_v30 = vld [vmem:[#allocation3 + $0x47] ss:$2 sm:$0xf]  ;;  %v1612_v32 = vld [vmem:[#allocation3 + $0x39] ss:$2 sm:$0xf] }
 0x369   : > { %v2662_v38 = vpop.f32.mrb[20].mxu1 }
 0x36a   : > { %v1518_v39 = vadd.f32 %v2662_v38, %v2526_v18  ;;  %v1509_v40 = vpop.f32.mrb[21].mxu1 }
 0x36b   : > { %v1510_v42 = vadd.f32 %v2526_v18, %v1509_v40  ;;  %v2663_v43 = vpop.f32.mrb[22].mxu1  ;;  %v1714_v40 = vcombine.low %v1619_v21, %v1621_v30  ;;  %v2953_v30 = vld [vmem:[%s3828_s9 + $0x40] sm:$0xff]  }
 0x36c   : > { %2977 = vrcp.f32 %v1518_v39  ;;  %v1521_v41 = vadd.f32 %v2663_v43, %v2526_v18  ;;  %v1512_v45 = vpop.f32.mrb[23].mxu1  ;;  %v1627_v43 = vld [vmem:[#allocation3 + $0x28] ss:$2 sm:$0xf]  ;;  %2593 = vmatprep.subr.bf16.mxu1 %v2953_v30 }
 0x36d   : > { %2979 = vrcp.f32 %v1510_v42  ;;  %v1513_v46 = vadd.f32 %v2526_v18, %v1512_v45  ;;  %v1702_v42 = vcombine.low %v1610_v31, %v1612_v32  ;;  %v2954_v31 = vld [vmem:[%s3828_s9] sm:$0xff]   ;;  %v2955_v32 = vld [vmem:[%s3828_s9 + $0x48] sm:$0xff]  }
 0x36e   : > { %2981 = vrcp.f32 %v1521_v41  ;;  %v1629_v41 = vld [vmem:[#allocation3 + $0x48] ss:$2 sm:$0xf]  ;;  %2594 = vmatpush3.bf16.msra.mxu1 %v2954_v31 }
 0x36f   : > { %2983 = vrcp.f32 %v1513_v46  ;;  %2595 = vmatprep.subr.bf16.mxu1 %v2955_v32 }
 0x372   : > { %2596 = vmatpush3.bf16.msra.mxu1 %v2956_v33 }
 0x376   : > { %v2978_v47 = vpop.eup %2977 }
 0x377   : > { %v2980_v27 = vpop.eup %2979  ;;  %v1538_v44 = vmul.f32 %v2978_v47, %v3585_v3  ;;  %v1578_v3 = vld [vmem:[#allocation3 + $0x8] ss:$2 sm:$0xf] }
 0x378   : > { %v2982_v48 = vpop.eup %2981  ;;  %v1536_v49 = vmul.f32 %v2980_v27, %v3578_v58  ;;  %v1635_v58 = vld [vmem:[#allocation3 + $0x29] ss:$2 sm:$0xf]  ;;  %v1654_v29 = vcombine.low %v1578_v3, %v1580_v4  ;;  %v1726_v27 = vcombine.low %v1627_v43, %v1629_v41 }
 0x379   : > { %v2984_v50 = vpop.eup %2983  ;;  %1567 = vst.msk [vmem:[#allocation3 + $0x78] sm:$0xff] %vm737_vm3, %v1538_v44  ;;  %v1539_v51 = vmul.f32 %v2982_v48, %v3587_v6  ;;  %v1738_v11 = vcombine.low %v1635_v58, %v1637_v59 }
 0x37a   : > { %1565 = vst.msk [vmem:[#allocation3 + $0x58] sm:$0xff] %vm737_vm3, %v1536_v49  ;;  %v1537_v53 = vmul.f32 %v2984_v50, %v3580_v61  ;;  %v1590_v61 = vld [vmem:[#allocation3 + $0x49] ss:$2 sm:$0xf] }
 0x37b   : > { %1568 = vst.msk [vmem:[#allocation3 + $0x88] sm:$0xff] %vm737_vm3, %v1539_v51  ;;  %v1570_v50 = vld [vmem:[#allocation3 + $0x7] ss:$2 sm:$0xf] }
 0x37c   : > { %1566 = vst.msk [vmem:[#allocation3 + $0x68] sm:$0xff] %vm737_vm3, %v1537_v53  ;;  %v1572_v51 = vld [vmem:[#allocation3 + $0x27] ss:$2 sm:$0xf] }
 0x37d   : > { %v1574_v53 = vld [vmem:[#allocation3 + $0x47] ss:$2 sm:$0xf]  ;;  %v1646_v55 = vcombine.low %v1570_v50, %v1572_v51  ;;  %v1948_v50 = vlaneseq }
 0x380   : > { %v1608_v60 = vld [vmem:[#allocation3 + $0x78] ss:$2 sm:$0xf]  ;;  %v1600_v62 = vld [vmem:[#allocation3 + $0x77] ss:$2 sm:$0xf] }
 0x381   : > { %v1606_v63 = vld [vmem:[#allocation3 + $0x58] ss:$2 sm:$0xf]  ;;  %v1598_v0 = vld [vmem:[#allocation3 + $0x57] ss:$2 sm:$0xf] }
 0x382   : > { %v1691_v6 = vcombine.low %v1606_v63, %v1608_v60  ;;  %v1679_v8 = vcombine.low %v1598_v0, %v1600_v62  ;;  %v1641_v24 = vld [vmem:[#allocation3 + $0x89] ss:$2 sm:$0xf]  ;;  %v1614_v23 = vld [vmem:[#allocation3 + $0x59] ss:$2 sm:$0xf] }
 0x383   : > { %v1639_v10 = vld [vmem:[#allocation3 + $0x69] ss:$2 sm:$0xf]  ;;  %v1584_v18 = vld [vmem:[#allocation3 + $0x68] ss:$2 sm:$0xf] }
 0x384   : > { %v1592_v12 = vld [vmem:[#allocation3 + $0x69] ss:$2 sm:$0xf]  ;;  %v2869_v14 = vpack.i.bf16 %v1691_v6, %v1690_v5  ;;  %v2864_v15 = vpack.i.bf16 %v1679_v8, %v1678_v7  ;;  %v1739_v16 = vcombine.low %v1639_v10, %v1641_v24  ;;  %v1655_v20 = vcombine.low %v1582_v9, %v1584_v18  ;;  %v1616_v25 = vld [vmem:[#allocation3 + $0x79] ss:$2 sm:$0xf] }
 0x385   : > { %v1625_v13 = vld [vmem:[#allocation3 + $0x87] ss:$2 sm:$0xf]  ;;  %v1667_v17 = vcombine.low %v1590_v61, %v1592_v12  ;;  %v1703_v37 = vcombine.low %v1614_v23, %v1616_v25  ;;  %v1631_v38 = vld [vmem:[#allocation3 + $0x68] ss:$2 sm:$0xf] }
 0x386   : > { %v1623_v19 = vld [vmem:[#allocation3 + $0x67] ss:$2 sm:$0xf]  ;;  %2870 = vrot.lane.b32.xlu1 %v2869_v14, %s3838_s22  ;;  %2865 = vrot.lane.b32.xlu0 %v2864_v15, %s3057_s15  ;;  %v1757_v26 = vpack.c.bf16 %v1739_v16, %v1738_v11  ;;  %v2874_v35 = vpack.i.bf16 %v1655_v20, %v1654_v29  ;;  %v1633_v39 = vld [vmem:[#allocation3 + $0x88] ss:$2 sm:$0xf] }
 0x387   : > { %v2884_v34 = vpack.i.bf16 %v1667_v17, %v1666_v28  ;;  %v1715_v36 = vcombine.low %v1623_v19, %v1625_v13  ;;  %s3845_s15 = smov 32   ;;  %v2879_v46 = vpack.i.bf16 %v1703_v37, %v1702_v42  ;;  %v1727_v47 = vcombine.low %v1631_v38, %v1633_v39  ;;  %v1576_v52 = vld [vmem:[#allocation3 + $0x67] ss:$2 sm:$0xf]  ;;  %v2951_v28 = vld [vmem:[%s3828_s9 + $0x80] sm:$0xff]   ;;  %v2952_v29 = vld [vmem:[%s3828_s9 + $0x88] sm:$0xff]  }
 0x388   : > { %2542 = vmatprep.mubr.msk.bf16.mxu0 %vm737_vm3, %v1757_v26  ;;  %v1647_v56 = vcombine.low %v1574_v53, %v1576_v52  ;;  %v2961_v37 = vld [vmem:[%s3828_s9 + $0x60] sm:$0xff]   ;;  %v2963_v39 = vld [vmem:[%s3828_s9 + $0x68] sm:$0xff]   ;;  %v1949_v53 = vshrl.u32 %v1948_v50, 7 }
 0x389   : > { %v2889_v45 = vpack.i.bf16 %v1715_v36, %v1714_v40  ;;  %v2894_v44 = vpack.i.bf16 %v1727_v47, %v1726_v27  ;;  %v2960_v36 = vld [vmem:[%s3828_s9 + $0x18] sm:$0xff]   ;;  %v2962_v38 = vld [vmem:[%s3828_s9 + $0x20] sm:$0xff]   ;;  %v2964_v40 = vld [vmem:[%s3828_s9 + $0x28] sm:$0xff]  }
 0x38a   : > { %2885 = vrot.lane.b32.xlu1 %v2884_v34, %s3845_s15  ;;  %2875 = vrot.lane.b32.xlu0 %v2874_v35, %s3846_s14  ;;  %v2958_v34 = vld [vmem:[%s3828_s9 + $0x10] sm:$0xff]   ;;  %v2959_v35 = vld [vmem:[%s3828_s9 + $0x58] sm:$0xff]  }
 0x38b   : > { %v2532_v42 = vld [vmem:[%s3827_s8] ss:$0 sm:$0xff] }
 0x38e   : > { %2890 = vrot.lane.b32.xlu1 %v2889_v45, %s3847_s13  ;;  %2880 = vrot.lane.b32.xlu0 %v2879_v46, %s3848_s16 }
 0x392   : > { %2895 = vrot.lane.b32.xlu0 %v2894_v44, %s3849_s30  ;;  %s3772_s30 = scalar_lea.hbm %s3830_s11, %s2569_s0 }
 0x3f8   : > { %v2871_v48 = vpop.permute.xlu1 %2870  ;;  %v2866_v49 = vpop.permute.xlu0 %2865 }
 0x3f9   : > { %v2868_v1 = vunpack.i.h.bf16 %v2866_v49  ;;  %v2867_v2 = vunpack.i.l.bf16 %v2866_v49  ;;  %v2873_v6 = vunpack.i.h.bf16 %v2871_v48  ;;  %v2872_v7 = vunpack.i.l.bf16 %v2871_v48 }
 0x3fa   : > { %v3060_v48 = vmov 1983009808  }
 0x3fb   : > { %v1946_v49 = vunpack.c.l.s4 %v3060_v48 }
 0x3fc   : > { %v2886_v54 = vpop.permute.xlu1 %2885  ;;  %v2876_v57 = vpop.permute.xlu0 %2875 }
 0x3fd   : > { %v2888_v58 = vunpack.i.h.bf16 %v2886_v54  ;;  %v2887_v59 = vunpack.i.l.bf16 %v2886_v54  ;;  %v2878_v60 = vunpack.i.h.bf16 %v2876_v57  ;;  %v2877_v62 = vunpack.i.l.bf16 %v2876_v57  ;;  %v1910_v54 = vld [vmem:[#allocation4 + $0x8] ss:$2 sm:$0x3] }
 0x3fe   : > { %v1947_v52 = vunpack.c.0.s8 %v1946_v49 }
 0x3ff   : > { %v1743_v63 = vsel %vm737_vm3, %v1647_v56, %v2878_v60  ;;  %v1742_v0 = vsel %vm737_vm3, %v1646_v55, %v2877_v62  ;;  %v1914_v55 = vld [vmem:[#allocation4 + $0x9] ss:$2 sm:$0x3] }
 0x400   : > { %v1745_v61 = vsel %vm1202_vm4, %v1743_v63, %v2888_v58  ;;  %v1744_v3 = vsel %vm1202_vm4, %v1742_v0, %v2887_v59  ;;  %v2891_v4 = vpop.permute.xlu1 %2890  ;;  %v2881_v5 = vpop.permute.xlu0 %2880  ;;  %v3730_v57 = vsub.s32 %v1947_v52, %v1949_v53  ;;  %v2965_v58 = vld [vmem:[%s3828_s9 + $0x70] sm:$0xff]  }
 0x401   : > { %v2883_v8 = vunpack.i.h.bf16 %v2881_v5  ;;  %v2882_v24 = vunpack.i.l.bf16 %v2881_v5  ;;  %v2893_v9 = vunpack.i.h.bf16 %v2891_v4  ;;  %v2892_v10 = vunpack.i.l.bf16 %v2891_v4  ;;  %v2966_v59 = vld [vmem:[%s3828_s9 + $0x30] sm:$0xff]  }
 0x402   : > { %v1746_v11 = vsel %vm1211_vm5, %v1744_v3, %v2867_v2  ;;  %v1747_v12 = vsel %vm1211_vm5, %v1745_v61, %v2868_v1 }
 0x403   : > { %v1748_v13 = vsel %vm1220_vm6, %v1746_v11, %v2872_v7  ;;  %v1749_v14 = vsel %vm1220_vm6, %v1747_v12, %v2873_v6 }
 0x404   : > { %v1750_v15 = vsel %vm1229_vm7, %v1748_v13, %v2882_v24  ;;  %v1751_v16 = vsel %vm1229_vm7, %v1749_v14, %v2883_v8  ;;  %v2896_v17 = vpop.permute.xlu0 %2895 }
 0x405   : > { %v2898_v18 = vunpack.i.h.bf16 %v2896_v17  ;;  %v2897_v19 = vunpack.i.l.bf16 %v2896_v17  ;;  %v1752_v20 = vsel %vm1238_vm8, %v1750_v15, %v2892_v10  ;;  %v1753_v21 = vsel %vm1238_vm8, %v1751_v16, %v2893_v9 }
 0x407   : > { %v1754_v23 = vsel %vm1247_vm9, %v1752_v20, %v2897_v19  ;;  %v1755_v25 = vsel %vm1247_vm9, %v1753_v21, %v2898_v18  ;;  %v2967_v19 = vld [vmem:[%s3828_s9 + $0x78] sm:$0xff]  }
 0x408   : > { %v1756_v26 = vpack.c.bf16 %v1755_v25, %v1754_v23  ;;  %v2968_v20 = vld [vmem:[%s3828_s9 + $0x38] sm:$0xff]  }
 0x40a   : > { %1873 = vmatmul.mubr.bf16.vlgmr.msra.gmra.mrb[32].mxu0 %v1756_v26 }
 0x40b   : > { %2665 = vmatpush3.bf16.msra.mxu0 %v2951_v28  ;;  %2668 = vmatprep.mubr.msk.bf16.mxu0 %vm3059_vm11, %v3050_v22 }
 0x40c   : > { %2666 = vmatprep.subr.bf16.mxu0 %v3050_v22  ;;  %v2957_v22 = vld [vmem:[%s3828_s9 + $0x50] sm:$0xff]  }
 0x40d   : > { %2597 = vmatprep.subr.bf16.mxu1 %v2957_v22 }
 0x40e   : > { %2598 = vmatpush3.bf16.msra.mxu1 %v2958_v34 }
 0x40f   : > { %2667 = vmatpush3.bf16.msra.mxu0 %v2952_v29  ;;  %2599 = vmatprep.subr.bf16.mxu1 %v2959_v35  ;;  %v1906_v29 = vld [vmem:[#allocation4 + $0x7] ss:$2 sm:$0x3] }
 0x412   : > { %2600 = vmatpush3.bf16.msra.mxu1 %v2960_v36 }
 0x413   : > { %2601 = vmatprep.subr.bf16.mxu1 %v2961_v37 }
 0x416   : > { %2602 = vmatpush3.bf16.msra.mxu1 %v2962_v38 }
 0x417   : > { %2603 = vmatprep.subr.bf16.mxu1 %v2963_v39 }
 0x41a   : > { %2604 = vmatpush3.bf16.msra.mxu1 %v2964_v40 }
 0x41b   : > { %2605 = vmatprep.subr.bf16.mxu1 %v2965_v58  ;;  %v2543_v58 = vld [vmem:[%s3829_s10] ss:$0 sm:$0xff] }
 0x41e   : > { %2606 = vmatpush3.bf16.msra.mxu1 %v2966_v59 }
 0x41f   : > { %2607 = vmatprep.subr.bf16.mxu1 %v2967_v19 }
 0x422   : > { %2608 = vmatpush3.bf16.msra.mxu1 %v2968_v20 }
 0x4dd   : > { %v1874_v43 = vpop.f32.mrb[32].mxu0 }
 0x4de   : > { %v1875_v41 = vadd.f32 %v2532_v42, %v1874_v43  ;;  %v1876_v45 = vpop.f32.mrb[33].mxu0 }
 0x4df   : > { %v1877_v46 = vpop.f32.mrb[34].mxu0 }
 0x4e0   : > { %v1883_v47 = vcombine.high %v1875_v41, %v1875_v41  ;;  %1901 = vst.msk [vmem:[#allocation4 + $0x18] sm:$0xf] %vm1888_vm10, %v1875_v41  ;;  %v1878_v27 = vadd.f32 %v2532_v42, %v1877_v46  ;;  %v1879_v44 = vpop.f32.mrb[35].mxu0 }
 0x4e2   : > { %1902 = vst.msk [vmem:[#allocation4 + $0x28] sm:$0xf] %vm1888_vm10, %v1883_v47  ;;  %v1884_v51 = vcombine.high %v1878_v27, %v1878_v27  ;;  %1903 = vst.msk [vmem:[#allocation4 + $0x38] sm:$0xf] %vm1888_vm10, %v1878_v27 }
 0x4e4   : > { %1904 = vst.msk [vmem:[#allocation4 + $0x48] sm:$0xf] %vm1888_vm10, %v1884_v51 }
 0x4e7   : > { %v1926_v56 = vld [vmem:[#allocation4 + $0x19] ss:$2 sm:$0x3]  ;;  %v1922_v32 = vld [vmem:[#allocation4 + $0x18] ss:$2 sm:$0x3] }
 0x4e8   : > { %v1918_v61 = vld [vmem:[#allocation4 + $0x17] ss:$2 sm:$0x3] }
 0x4e9   : > { %v1912_v60 = vld [vmem:[#allocation4 + $0x28] ss:$2 sm:$0x3]  ;;  %v1928_v62 = vld [vmem:[#allocation4 + $0x39] ss:$2 sm:$0x3] }
 0x4ea   : > { %v1955_v63 = vcombine.low %v1910_v54, %v1912_v60  ;;  %v2005_v0 = vcombine.low %v1926_v56, %v1928_v62  ;;  %v1939_v1 = vld [vmem:[#allocation4 + $0x29] ss:$2 sm:$0x3]  ;;  %v1920_v9 = vld [vmem:[#allocation4 + $0x37] ss:$2 sm:$0x3] }
 0x4eb   : > { %v1916_v2 = vld [vmem:[#allocation4 + $0x29] ss:$2 sm:$0x3]  ;;  %v1935_v11 = vld [vmem:[#allocation4 + $0x28] ss:$2 sm:$0x3]  ;;  %v1981_v13 = vcombine.low %v1918_v61, %v1920_v9 }
 0x4ec   : > { %v1941_v3 = vld [vmem:[#allocation4 + $0x49] ss:$2 sm:$0x3]  ;;  %v1968_v5 = vcombine.low %v1914_v55, %v1916_v2  ;;  %v1962_v6 = vrot.slane %v1955_v63, %v3730_v57  ;;  %v2012_v7 = vrot.slane %v2005_v0, %v3730_v57  ;;  %v1937_v12 = vld [vmem:[#allocation4 + $0x48] ss:$2 sm:$0x3] }
 0x4ed   : > { %v1931_v4 = vld [vmem:[#allocation4 + $0x27] ss:$2 sm:$0x3]  ;;  %v2044_v8 = vcombine.low %v1939_v1, %v1941_v3  ;;  %v2031_v16 = vcombine.low %v1935_v11, %v1937_v12  ;;  %v1988_v23 = vrot.slane %v1981_v13, %v3730_v57  ;;  %v1924_v30 = vld [vmem:[#allocation4 + $0x38] ss:$2 sm:$0x3] }
 0x4ee   : > { %v1933_v24 = vld [vmem:[#allocation4 + $0x47] ss:$2 sm:$0x3]  ;;  %v2899_v14 = vpack.i.bf16 %v1962_v6, %v2012_v7  ;;  %v1975_v17 = vrot.slane %v1968_v5, %v3730_v57  ;;  %v1994_v33 = vcombine.low %v1922_v32, %v1924_v30 }
 0x4ef   : > { %v2018_v10 = vcombine.low %v1931_v4, %v1933_v24  ;;  %v2051_v15 = vrot.slane %v2044_v8, %v3730_v57  ;;  %v2038_v25 = vrot.slane %v2031_v16, %v3730_v57  ;;  %v1908_v31 = vld [vmem:[#allocation4 + $0x27] ss:$2 sm:$0x3] }
 0x4f0   : > { %2900 = vrot.lane.b32.xlu1 %v2899_v14, %s3845_s15  ;;  %v1944_v22 = vcombine.low %v1906_v29, %v1908_v31  ;;  %v2001_v35 = vrot.slane %v1994_v33, %v3730_v57 }
 0x4f1   : > { %v2025_v18 = vrot.slane %v2018_v10, %v3730_v57  ;;  %v2061_v21 = vpack.c.bf16 %v2051_v15, %v2051_v15  ;;  %v2909_v28 = vpack.i.bf16 %v1988_v23, %v2038_v25 }
 0x4f2   : > { %v1951_v38 = vrot.slane %v1944_v22, %v3730_v57 }
 0x4f3   : > { %v2904_v26 = vpack.i.bf16 %v1975_v17, %v2025_v18  ;;  %2669 = vmatmul.mubr.msk.bf16.vlgmr.msra.gmra.mrb[36].mxu0 %vm1202_vm4, %v2061_v21 }
 0x4f4   : > { %2910 = vrot.lane.b32.xlu1 %v2909_v28, %s3847_s13  ;;  %s377_s13 = sand.u32 1, %s3039_s18  }
 0x4f5   : > { %2905 = vrot.lane.b32.xlu0 %v2904_v26, %s3850_s25  ;;  %s2474_s24 = sshll.u32 %s377_s13, 2  ;;  %s3776_s25 = scalar_lea.sflag [#allocation6], %s377_s13 }
 0x4f6   : > { %s379_s1 = scalar_lea.vmem [#allocation5], %s2474_s24  ;;  %s3061_s24 = smov [#allocation5]  }
 0x4f7   : > { %s2324_s14 = sshll.u32 %s379_s1, 4  ;;  %s2989_s29 = sshll.u32 %s3061_s24, 4  ;;  %s3774_s14 = int_to_ptr.vmem [resolvable:$true] %s2324_s14  ;;  %s2990_s29 = int_to_ptr.vmem [resolvable:$false] %s2989_s29 }
 0x4f8   : > { %s2985_s21 = scalar_lea.vmem %s3774_s14, 64  ;;  %s2991_s12 = scalar_lea.vmem %s2990_s29, 128 }
 0x4f9   : > { %p2986_p11 = scmp.ne.s32.totalorder %s3774_s14, %s2985_s21  ;;  %p2992_p0 = scmp.lt.s32.totalorder %s3774_s14, %s2990_s29 }
 0x4fa   : > { %p2993_p1 = scmp.lt.s32.totalorder %s2991_s12, %s2985_s21 }
 0x4fb   : > { %p2987_p12 = pnand %p2986_p11, %p3161_p5 }
 0x4fc   : > { %p2994_p2 = por %p2993_p1, %p2992_p0 }
 0x4fd   : > { %p2988_p13 = pneg %p2987_p12 }
 0x4ff   : > { %p2995_p3 = pnand %p2994_p2, %p2988_p13 }
 0x562   : > { %v2901_v34 = vpop.permute.xlu1 %2900 }
 0x563   : > { %v2903_v36 = vunpack.i.h.bf16 %v2901_v34  ;;  %v2902_v37 = vunpack.i.l.bf16 %v2901_v34 }
 0x565   : > { %v2053_v39 = vsel %vm1202_vm4, %v1951_v38, %v2903_v36  ;;  %v2056_v40 = vsel %vm1202_vm4, %v2001_v35, %v2902_v37 }
 0x566   : > { %v2911_v45 = vpop.permute.xlu1 %2910 }
 0x567   : > { %v2906_v42 = vpop.permute.xlu0 %2905  ;;  %v2913_v46 = vunpack.i.h.bf16 %v2911_v45  ;;  %v2912_v47 = vunpack.i.l.bf16 %v2911_v45 }
 0x568   : > { %v2908_v43 = vunpack.i.h.bf16 %v2906_v42  ;;  %v2907_v41 = vunpack.i.l.bf16 %v2906_v42 }
 0x56a   : > { %v2054_v27 = vsel %vm1220_vm6, %v2053_v39, %v2908_v43  ;;  %v2057_v44 = vsel %vm1220_vm6, %v2056_v40, %v2907_v41 }
 0x56b   : > { %v2055_v48 = vsel %vm1238_vm8, %v2054_v27, %v2913_v46  ;;  %v2058_v49 = vsel %vm1238_vm8, %v2057_v44, %v2912_v47 }
 0x56c   : > { %v2059_v50 = vpack.c.bf16 %v2055_v48, %v2055_v48  ;;  %v2060_v51 = vpack.c.bf16 %v2058_v49, %v2058_v49 }
 0x56e   : > { %2248 = vmatprep.mubr.bf16.mxu1 %v2060_v51 }
 0x56f   : > { %2249 = vmatmul.mubr.bf16.vlgmr.msra.gmra.mrb[24].mxu1 %v2059_v50 }
 0x5c6   : > { %v2290_v52 = vpop.f32.mrb[36].mxu0 }
 0x5c7   : > { %v2670_v53 = vpop.f32.mrb[37].mxu0 }
 0x5c8   : > { %v2293_v54 = vpop.f32.mrb[38].mxu0 }
 0x5c9   : > { %v2671_v55 = vpop.f32.mrb[39].mxu0 }
 0x642   : > { %v2609_v56 = vpop.f32.mrb[24].mxu1 }
 0x643   : > { %v2610_v59 = vpop.f32.mrb[25].mxu1 }
 0x644   : > { %v2611_v60 = vadd.f32 %v2610_v59, %v2609_v56  ;;  %v2612_v62 = vpop.f32.mrb[26].mxu1 }
 0x645   : > { %v2613_v63 = vpop.f32.mrb[27].mxu1 }
 0x646   : > { %v2251_v0 = vadd.f32 %v2611_v60, %v2543_v58 }
 0x648   : > { %v2291_v1 = vadd.f32 %v2290_v52, %v2251_v0 }
 0x64a   : > { %v2303_v2 = vrot.slane %v2291_v1, %v3730_v57 }
 0x64c   : > { %v2304_v61 = vcombine.high %v2303_v2, %v2303_v2  ;;  %2308 = vst.msk [vmem:[%s379_s1] sm:$0x3] %vm2307_vm12, %v2303_v2 }
 0x64e   : > { %2309 = vst.msk [vmem:[%s379_s1 + $0x2] sm:$0x3] %vm2307_vm12, %v2304_v61 }
 0x64f   : > { %2998 = shalt.err (!%p2995_p3)
}
 0x650   : > { %s2999_s13 = scalar_lea.hbm %s3772_s30, 64  ;;  %s3003_s16 = scalar_lea.hbm %s3830_s11, 128 }
 0x651   : > { %p3000_p4 = scmp.ne.s32.totalorder %s3772_s30, %s2999_s13  ;;  %p3004_p9 = scmp.lt.u32.totalorder %s3772_s30, %s3830_s11 }
 0x652   : > { %p3005_p10 = scmp.lt.u32.totalorder %s3003_s16, %s2999_s13  ;;  %p3007_p12 = scmp.lt.u32.totalorder %s2999_s13, %s3772_s30 }
 0x653   : > { %p3001_p7 = pnand %p3000_p4, %p3161_p5 }
 0x654   : > { %p3006_p11 = por %p3005_p10, %p3004_p9 }
 0x655   : > { %p3002_p8 = pneg %p3001_p7 }
 0x656   : > { %p3008_p13 = por %p3007_p12, %p3006_p11 }
 0x658   : > { %p3009_p0 = pnand %p3008_p13, %p3002_p8 }
 0x65a   : > { %3012 = shalt.err (!%p3009_p0)
}
 0x65b   : > { %s3062_s21 = smov 2  }
 0x65c   : > { %2672 = dma.vmem_to_hbm [thread:$0]  (%p3161_p5), %s3774_s14, 64, %s3772_s30, %s3776_s25, %s3845_s15, %s3845_s15, %s3062_s21  }
 0x65d PF: > { %p2678_p1 = scmp.ge.s32.totalorder %s3047_s20, 2  ;;  %s2339_s29 = sand.u32 1, %s3035_s17  }
 0x65e   : > { %s2340_s12 = scalar_lea.sflag [#allocation6], %s2339_s29 }
 0x65f   : > { %p2675_p2 = pnand %p2678_p1, %p3165_p6 }
 0x661   : > { %3030 = dma.done.wait (!%p2675_p2), %s2340_s12, 64  }
 0x662   : > { %3032 = vsyncadd (!%p2675_p2), %s2340_s12, 4294967232  ;;  %p21_p3 = scmp.ge.s32.totalorder %s3148_s23, 4   ;;  %s3851_s17 = smov %s3039_s18 }
 0x663   : > { %s3852_s18 = smov %s3043_s19  ;;  %s3853_s19 = smov %s3159_s26 }
 0x664   : > { %s3854_s20 = smov %s3148_s23  ;;  %23 = sbr.rel (!%p21_p3) target bundleno = 6 (0x6), region = 231 }
 0x66b   :  { %2345 = vsyncpa [#allocation6], 1 }
 0x66c   :  { %2347 = vsyncpa [#allocation6 + $0x1], 1 }

</bundles_post_ra>
